<compile_context>
chip_gen: v5e
topology: v5e:2x2
jax: 0.10.0
libtpu: 0.0.40
codegen_flags: <defaults>
</compile_context>

<pallas_src>
import math
import numpy as np
import jax
import jax.numpy as jnp
from jax import lax
from jax.experimental import pallas as pl
from jax.experimental.pallas import tpu as pltpu

N_EMBD = 144
N_HEAD = 4
HEAD_SIZE = N_EMBD // N_HEAD          # 36
BLOCK_SIZE = 128                      # span of the relative-position table
EPS = 1e-5


# ----------------------------------------------------------------------------
# Kernel 1: LayerNorm(ln1) + Q/K/V projections, row-tiled over (B*T, C).
# Three separate matmuls -> three lane-dense bf16 outputs (no in-kernel lane
# slicing at non-128-aligned offsets).  K is pre-scaled by 1/sqrt(head_size).
# ----------------------------------------------------------------------------
def ln_qkv_kernel(x_ref, g_ref, b_ref, wq_ref, wk_ref, wv_ref,
                  q_ref, k_ref, v_ref):
    x = x_ref[...]                                             # (Rt, C) f32
    mean = jnp.mean(x, axis=-1, keepdims=True)
    var = jnp.mean(jnp.square(x - mean), axis=-1, keepdims=True)
    xn = ((x - mean) * lax.rsqrt(var + EPS) * g_ref[0] + b_ref[0]
          ).astype(jnp.bfloat16)
    q_ref[...] = jnp.dot(xn, wq_ref[...],
                         preferred_element_type=jnp.float32).astype(jnp.bfloat16)
    k_ref[...] = jnp.dot(xn, wk_ref[...],
                         preferred_element_type=jnp.float32).astype(jnp.bfloat16)
    v_ref[...] = jnp.dot(xn, wv_ref[...],
                         preferred_element_type=jnp.float32).astype(jnp.bfloat16)


def ln_qkv(x2d, ln1_w, ln1_b, wq, wk, wv):
    R, C = x2d.shape
    Rt = R if R <= 512 else 512                   # big row tiles amortize overhead
    grid = (pl.cdiv(R, Rt),)
    row_spec = pl.BlockSpec((Rt, C), lambda i: (i, 0))
    vec_spec = pl.BlockSpec((1, C), lambda i: (0, 0))
    mat_spec = pl.BlockSpec((C, C), lambda i: (0, 0))
    out_sd = jax.ShapeDtypeStruct((R, C), jnp.bfloat16)
    cost = pl.CostEstimate(
        flops=2 * R * C * 3 * C,
        transcendentals=0,
        bytes_accessed=R * C * 4 + 3 * R * C * 2 + 3 * C * C * 2 + 2 * C * 4)
    return pl.pallas_call(
        ln_qkv_kernel,
        grid=grid,
        in_specs=[row_spec, vec_spec, vec_spec, mat_spec, mat_spec, mat_spec],
        out_specs=(row_spec, row_spec, row_spec),
        out_shape=(out_sd, out_sd, out_sd),
        compiler_params=pltpu.CompilerParams(dimension_semantics=("parallel",)),
        cost_estimate=cost,
    )(x2d, ln1_w, ln1_b, wq, wk, wv)


# ----------------------------------------------------------------------------
# Kernel 2: attention (4 heads) + output projection + residual + LN2 + FFN +
#           residual, for a tile of Bt batch elements per grid step.
# Head merge is folded into the out-projection (sum_h ctx_h @ Wproj_rows_h),
# so no lane-misaligned concatenation is needed.
# ----------------------------------------------------------------------------
def attn_ffn_kernel(q_ref, k_ref, v_ref, bias_ref, x_ref,
                    wproj_ref, bproj_ref, ln2w_ref, ln2b_ref,
                    w1_ref, b1_ref, w2_ref, b2_ref, o_ref):
    Bt = q_ref.shape[0]
    T = q_ref.shape[2]
    row = lax.broadcasted_iota(jnp.int32, (T, T), 0)
    col = lax.broadcasted_iota(jnp.int32, (T, T), 1)
    causal = row >= col                          # hoisted: shared by all bt / heads

    for bt in range(Bt):                         # static unroll over the batch tile
        sa = jnp.zeros((T, N_EMBD), jnp.float32)
        for h in range(N_HEAD):                  # static unroll over 4 heads
            q_h = q_ref[bt, h]                   # (T, hs) bf16
            k_h = k_ref[bt, h]                   # (T, hs) bf16, pre-scaled
            v_h = v_ref[bt, h]                   # (T, hs) bf16
            s = lax.dot_general(q_h, k_h, (((1,), (1,)), ((), ())),
                                preferred_element_type=jnp.float32)    # (T, T)
            s = s + bias_ref[bt, h].astype(jnp.float32)   # relative-position bias
            s = jnp.where(causal, s, -1e30)      # finite mask; diag always unmasked
            m = jnp.max(s, axis=-1, keepdims=True)
            e = jnp.exp(s - m)
            inv = pl.reciprocal(jnp.sum(e, axis=-1, keepdims=True), approx=True)
            att = (e * inv).astype(jnp.bfloat16)
            # TODO(synk): attention dropout omitted (eval-mode identity)
            ctx_h = jnp.dot(att, v_h, preferred_element_type=jnp.float32)
            # head merge folded into the out-projection (Wproj row-block h)
            sa = sa + jnp.dot(ctx_h.astype(jnp.bfloat16), wproj_ref[h],
                              preferred_element_type=jnp.float32)

        x1 = x_ref[bt] + sa + bproj_ref[0]                     # residual 1 (f32)

        mean = jnp.mean(x1, axis=-1, keepdims=True)
        var = jnp.mean(jnp.square(x1 - mean), axis=-1, keepdims=True)
        xn2 = ((x1 - mean) * lax.rsqrt(var + EPS) * ln2w_ref[0] + ln2b_ref[0]
               ).astype(jnp.bfloat16)

        hdn = jnp.dot(xn2, w1_ref[...],
                      preferred_element_type=jnp.float32) + b1_ref[0]
        hdn = jnp.maximum(hdn, 0.0).astype(jnp.bfloat16)       # ReLU
        ff = jnp.dot(hdn, w2_ref[...],
                     preferred_element_type=jnp.float32) + b2_ref[0]
        # TODO(synk): FFN dropout omitted (eval-mode identity)

        o_ref[bt] = (x1 + ff).astype(o_ref.dtype)              # residual 2


def attn_ffn(qh, kh, vh, rel_bias, x, wproj_r, bproj, ln2_w, ln2_b,
             w1, b1, w2, b2):
    B, T, C = x.shape
    H, hs = N_HEAD, HEAD_SIZE
    H4 = w1.shape[1]
    # Batch tile: amortize per-step overhead while keeping grid >= 2 (v7x has
    # 2 TensorCores) and the double-buffered VMEM footprint small (<< 32 MiB
    # scoped default, safe on v7x's 64 MiB physical VMEM).
    Bt = max(1, min(8, B // 2))
    grid = (pl.cdiv(B, Bt),)

    heads_spec = pl.BlockSpec((Bt, H, T, hs), lambda i: (i, 0, 0, 0))
    bias_spec = pl.BlockSpec((Bt, H, T, T), lambda i: (i, 0, 0, 0))
    x_spec = pl.BlockSpec((Bt, T, C), lambda i: (i, 0, 0))
    cvec = pl.BlockSpec((1, C), lambda i: (0, 0))

    flops = B * (4 * H * T * T * hs + 2 * T * C * C + 4 * T * C * H4)
    bytes_acc = (3 * B * H * T * hs * 2 + B * H * T * T * 2 + 2 * B * T * C * 4
                 + H * hs * C * 2 + C * H4 * 2 + H4 * C * 2 + (3 * C + H4) * 4)
    cost = pl.CostEstimate(flops=flops, transcendentals=B * H * T * T,
                           bytes_accessed=bytes_acc)

    return pl.pallas_call(
        attn_ffn_kernel,
        grid=grid,
        in_specs=[
            heads_spec, heads_spec, heads_spec, bias_spec, x_spec,
            pl.BlockSpec((H, hs, C), lambda i: (0, 0, 0)),       # Wproj (row blocks)
            cvec, cvec, cvec,
            pl.BlockSpec((C, H4), lambda i: (0, 0)),
            pl.BlockSpec((1, H4), lambda i: (0, 0)),
            pl.BlockSpec((H4, C), lambda i: (0, 0)), cvec,
        ],
        out_specs=x_spec,
        out_shape=jax.ShapeDtypeStruct((B, T, C), jnp.float32),
        compiler_params=pltpu.CompilerParams(dimension_semantics=("parallel",)),
        cost_estimate=cost,
    )(qh, kh, vh, rel_bias, x, wproj_r, bproj, ln2_w, ln2_b, w1, b1, w2, b2)


# ----------------------------------------------------------------------------
# Full Block forward.  XLA glue: free contiguous reshapes (the torch `view`
# head split must happen at the HBM level) plus the tiny bf16 relative-bias
# matmul + skew.
# ----------------------------------------------------------------------------
def block_forward(x, p):
    B, T, C = x.shape
    assert T <= BLOCK_SIZE, "relative-position table only covers T <= block_size"
    H, hs = N_HEAD, HEAD_SIZE
    scale = 1.0 / math.sqrt(hs)

    wq = p["wq"].astype(jnp.bfloat16)
    wk = (p["wk"] * scale).astype(jnp.bfloat16)     # fold score scale into K
    wv = p["wv"].astype(jnp.bfloat16)

    # --- kernel 1: LN1 + Q/K/V over the flattened token axis -----------------
    q2, k2, v2 = ln_qkv(x.reshape(B * T, C), p["ln1_w"], p["ln1_b"], wq, wk, wv)

    # Exact reproduction of torch's q.view(B, n_head, T, head_size): a
    # contiguous reinterpretation -> free reshape here.
    qh = q2.reshape(B, H, T, hs)
    kh = k2.reshape(B, H, T, hs)
    vh = v2.reshape(B, H, T, hs)

    # --- relative-position bias: matmul + skew, bf16 end to end --------------
    #   rel_bias[b,h,i,j] = q[b,h,i,:] . rel_table[i - j + BLOCK_SIZE - 1, :]
    # TODO(synk): the per-row "skew" (a per-row lane shift) has no robust
    # in-kernel equivalent short of pltpu.roll-with-stride / in-kernel reshape,
    # so it stays in XLA -- but every intermediate and the kernel input are bf16,
    # halving what was previously the dominant HBM stream.
    span = p["rel_table"][BLOCK_SIZE - T:BLOCK_SIZE + T - 1][::-1].astype(jnp.bfloat16)
    rl = jnp.einsum("bhtd,cd->bhtc", qh, span,
                    preferred_element_type=jnp.float32).astype(jnp.bfloat16)
    rl = jnp.pad(rl, ((0, 0), (0, 0), (0, 0), (0, 1)))           # (B,H,T,2T)
    rl = rl.reshape(B, H, 2 * T * T)[..., : T * (2 * T - 1)]
    rel_bias = rl.reshape(B, H, T, 2 * T - 1)[..., T - 1:]       # (B,H,T,T) bf16

    # --- kernel 2: attention + proj + residual + LN2 + FFN + residual --------
    wproj_r = p["wproj"].astype(jnp.bfloat16).reshape(H, hs, C)  # row blocks: free view
    return attn_ffn(qh, kh, vh, rel_bias, x, wproj_r, p["bproj"],
                    p["ln2_w"], p["ln2_b"],
                    p["w1"].astype(jnp.bfloat16), p["b1"],
                    p["w2"].astype(jnp.bfloat16), p["b2"])


# ----------------------------------------------------------------------------
# Pure-JAX f32 reference (mirrors the PyTorch forward exactly)
# ----------------------------------------------------------------------------
def block_reference(x, p):
    B, T, C = x.shape

    def ln(y, w, b):
        m = y.mean(-1, keepdims=True)
        v = ((y - m) ** 2).mean(-1, keepdims=True)
        return (y - m) / jnp.sqrt(v + EPS) * w + b

    xn = ln(x, p["ln1_w"][0], p["ln1_b"][0])
    q = (xn @ p["wq"]).reshape(B, N_HEAD, T, HEAD_SIZE)
    k = (xn @ p["wk"]).reshape(B, N_HEAD, T, HEAD_SIZE)
    v = (xn @ p["wv"]).reshape(B, N_HEAD, T, HEAD_SIZE)

    pos = jnp.arange(T)
    rel = p["rel_table"][pos[:, None] - pos[None, :] + BLOCK_SIZE - 1]   # (T,T,hs)

    scores = jnp.einsum("bhtd,bhsd->bhts", q, k) * (1.0 / HEAD_SIZE ** 0.5)
    rel_scores = jnp.einsum("bhtd,tsd->bhts", q, rel)
    scores = scores + rel_scores
    mask = jnp.tril(jnp.ones((T, T), bool))
    scores = jnp.where(mask, scores, -jnp.inf)
    att = jax.nn.softmax(scores, axis=-1)
    ctx = jnp.einsum("bhts,bhsd->bhtd", att, v)
    ctx = jnp.transpose(ctx, (0, 2, 1, 3)).reshape(B, T, C)
    sa = ctx @ p["wproj"] + p["bproj"][0]
    x1 = x + sa
    xn2 = ln(x1, p["ln2_w"][0], p["ln2_b"][0])
    h = jnp.maximum(xn2 @ p["w1"] + p["b1"][0], 0.0)
    ff = h @ p["w2"] + p["b2"][0]
    return x1 + ff


def make_params(key):
    ks = jax.random.split(key, 8)
    s = 0.02
    C, H4, HS = N_EMBD, 4 * N_EMBD, HEAD_SIZE
    return {
        "ln1_w": jnp.ones((1, C), jnp.float32),
        "ln1_b": jnp.zeros((1, C), jnp.float32),
        "wq": s * jax.random.normal(ks[0], (C, C), jnp.float32),
        "wk": s * jax.random.normal(ks[1], (C, C), jnp.float32),
        "wv": s * jax.random.normal(ks[2], (C, C), jnp.float32),
        "rel_table": s * jax.random.normal(ks[3], (2 * BLOCK_SIZE - 1, HS), jnp.float32),
        "wproj": s * jax.random.normal(ks[4], (C, C), jnp.float32),
        "bproj": jnp.zeros((1, C), jnp.float32),
        "ln2_w": jnp.ones((1, C), jnp.float32),
        "ln2_b": jnp.zeros((1, C), jnp.float32),
        "w1": s * jax.random.normal(ks[5], (C, H4), jnp.float32),
        "b1": 0.01 * jnp.ones((1, H4), jnp.float32),
        "w2": s * jax.random.normal(ks[6], (H4, C), jnp.float32),
        "b2": 0.01 * jnp.ones((1, C), jnp.float32),
    }


if __name__ == "__main__":
    B, T = 2, 8
    key = jax.random.PRNGKey(0)
    k_x, k_p = jax.random.split(key)
    x = jax.random.normal(k_x, (B, T, N_EMBD), jnp.float32)
    params = make_params(k_p)

    out = jax.block_until_ready(jax.jit(block_forward)(x, params))
    ref = jax.block_until_ready(block_reference(x, params))
    assert out.shape == (B, T, N_EMBD)
    # bf16 matmul operands (f32 accumulation) -> slightly looser tolerance vs f32 ref
    np.testing.assert_allclose(np.asarray(out), np.asarray(ref), rtol=2e-2, atol=2e-2)

    print("KERNEL_OK")
</pallas_src>

<mosaic_0001>
module attributes {stable_mosaic.version = 11 : i64} {
  func.func @ln_qkv_kernel(%arg0: i32, %arg1: memref<16x144xf32, #tpu.memory_space<vmem>>, %arg2: memref<1x144xf32, #tpu.memory_space<vmem>>, %arg3: memref<1x144xf32, #tpu.memory_space<vmem>>, %arg4: memref<144x144xbf16, #tpu.memory_space<vmem>>, %arg5: memref<144x144xbf16, #tpu.memory_space<vmem>>, %arg6: memref<144x144xbf16, #tpu.memory_space<vmem>>, %arg7: memref<16x144xbf16, #tpu.memory_space<vmem>>, %arg8: memref<16x144xbf16, #tpu.memory_space<vmem>>, %arg9: memref<16x144xbf16, #tpu.memory_space<vmem>>) attributes {dimension_semantics = [#tpu.dimension_semantics<parallel>], iteration_bounds = array<i64: 1>, scalar_prefetch = 0 : i64, scratch_operands = 0 : i64, tpu.core_type = #tpu.core_type<tc>, window_params = [{transform_indices = @transform_0, window_bounds = array<i64: 16, 144>}, {pipeline_mode = #tpu.pipeline_mode<synchronous>, transform_indices = @transform_1, window_bounds = array<i64: 1, 144>}, {pipeline_mode = #tpu.pipeline_mode<synchronous>, transform_indices = @transform_2, window_bounds = array<i64: 1, 144>}, {pipeline_mode = #tpu.pipeline_mode<synchronous>, transform_indices = @transform_3, window_bounds = array<i64: 144, 144>}, {pipeline_mode = #tpu.pipeline_mode<synchronous>, transform_indices = @transform_4, window_bounds = array<i64: 144, 144>}, {pipeline_mode = #tpu.pipeline_mode<synchronous>, transform_indices = @transform_5, window_bounds = array<i64: 144, 144>}, {transform_indices = @transform_6, window_bounds = array<i64: 16, 144>}, {transform_indices = @transform_7, window_bounds = array<i64: 16, 144>}, {transform_indices = @transform_8, window_bounds = array<i64: 16, 144>}]} {
    %c0 = arith.constant 0 : index
    %c0_0 = arith.constant 0 : index
    %0 = vector.load %arg1[%c0, %c0_0] : memref<16x144xf32, #tpu.memory_space<vmem>>, vector<16x144xf32>
    %cst = arith.constant dense<0.000000e+00> : vector<16xf32>
    %1 = vector.multi_reduction <add>, %0, %cst [1] : vector<16x144xf32> to vector<16xf32>
    %2 = vector.shape_cast %1 : vector<16xf32> to vector<16x1xf32>
    %cst_1 = arith.constant 1.440000e+02 : f32
    %3 = vector.broadcast %cst_1 : f32 to vector<16x1xf32>
    %4 = arith.divf %2, %3 : vector<16x1xf32>
    %5 = vector.broadcast %4 : vector<16x1xf32> to vector<16x144xf32>
    %6 = arith.subf %0, %5 : vector<16x144xf32>
    %7 = arith.mulf %6, %6 : vector<16x144xf32>
    %cst_2 = arith.constant dense<0.000000e+00> : vector<16xf32>
    %8 = vector.multi_reduction <add>, %7, %cst_2 [1] : vector<16x144xf32> to vector<16xf32>
    %9 = vector.shape_cast %8 : vector<16xf32> to vector<16x1xf32>
    %cst_3 = arith.constant 1.440000e+02 : f32
    %10 = vector.broadcast %cst_3 : f32 to vector<16x1xf32>
    %11 = arith.divf %9, %10 : vector<16x1xf32>
    %12 = vector.broadcast %4 : vector<16x1xf32> to vector<16x144xf32>
    %13 = arith.subf %0, %12 : vector<16x144xf32>
    %cst_4 = arith.constant 9.99999974E-6 : f32
    %14 = vector.broadcast %cst_4 : f32 to vector<16x1xf32>
    %15 = arith.addf %11, %14 : vector<16x1xf32>
    %16 = math.rsqrt %15 : vector<16x1xf32>
    %17 = vector.broadcast %16 : vector<16x1xf32> to vector<16x144xf32>
    %18 = arith.mulf %13, %17 : vector<16x144xf32>
    %c0_5 = arith.constant 0 : index
    %c0_6 = arith.constant 0 : index
    %19 = vector.load %arg2[%c0_5, %c0_6] : memref<1x144xf32, #tpu.memory_space<vmem>>, vector<1x144xf32>
    %20 = vector.shape_cast %19 : vector<1x144xf32> to vector<144xf32>
    %21 = vector.shape_cast %20 : vector<144xf32> to vector<1x144xf32>
    %22 = vector.broadcast %21 : vector<1x144xf32> to vector<16x144xf32>
    %23 = arith.mulf %18, %22 : vector<16x144xf32>
    %c0_7 = arith.constant 0 : index
    %c0_8 = arith.constant 0 : index
    %24 = vector.load %arg3[%c0_7, %c0_8] : memref<1x144xf32, #tpu.memory_space<vmem>>, vector<1x144xf32>
    %25 = vector.shape_cast %24 : vector<1x144xf32> to vector<144xf32>
    %26 = vector.shape_cast %25 : vector<144xf32> to vector<1x144xf32>
    %27 = vector.broadcast %26 : vector<1x144xf32> to vector<16x144xf32>
    %28 = arith.addf %23, %27 : vector<16x144xf32>
    %29 = arith.truncf %28 : vector<16x144xf32> to vector<16x144xbf16>
    %c0_9 = arith.constant 0 : index
    %c0_10 = arith.constant 0 : index
    %30 = vector.load %arg4[%c0_9, %c0_10] : memref<144x144xbf16, #tpu.memory_space<vmem>>, vector<144x144xbf16>
    %cst_11 = arith.constant dense<0.000000e+00> : vector<16x144xf32>
    %31 = tpu.matmul %29, %30, %cst_11 {dimension_numbers = #tpu.dot_dimension_numbers<[1], [0], [0], [1], [0, 0, 1, 1], [], []>} : vector<16x144xbf16>, vector<144x144xbf16>, vector<16x144xf32> -> vector<16x144xf32>
    %32 = arith.truncf %31 : vector<16x144xf32> to vector<16x144xbf16>
    %c0_12 = arith.constant 0 : index
    %c0_13 = arith.constant 0 : index
    %33 = vector.load %arg7[%c0_12, %c0_13] : memref<16x144xbf16, #tpu.memory_space<vmem>>, vector<16x144xbf16>
    tpu.vector_store %arg7[%c0_12, %c0_13], %32 {strides = array<i32>} : memref<16x144xbf16, #tpu.memory_space<vmem>>, vector<16x144xbf16>,
    %c0_14 = arith.constant 0 : index
    %c0_15 = arith.constant 0 : index
    %34 = vector.load %arg5[%c0_14, %c0_15] : memref<144x144xbf16, #tpu.memory_space<vmem>>, vector<144x144xbf16>
    %cst_16 = arith.constant dense<0.000000e+00> : vector<16x144xf32>
    %35 = tpu.matmul %29, %34, %cst_16 {dimension_numbers = #tpu.dot_dimension_numbers<[1], [0], [0], [1], [0, 0, 1, 1], [], []>} : vector<16x144xbf16>, vector<144x144xbf16>, vector<16x144xf32> -> vector<16x144xf32>
    %36 = arith.truncf %35 : vector<16x144xf32> to vector<16x144xbf16>
    %c0_17 = arith.constant 0 : index
    %c0_18 = arith.constant 0 : index
    %37 = vector.load %arg8[%c0_17, %c0_18] : memref<16x144xbf16, #tpu.memory_space<vmem>>, vector<16x144xbf16>
    tpu.vector_store %arg8[%c0_17, %c0_18], %36 {strides = array<i32>} : memref<16x144xbf16, #tpu.memory_space<vmem>>, vector<16x144xbf16>,
    %c0_19 = arith.constant 0 : index
    %c0_20 = arith.constant 0 : index
    %38 = vector.load %arg6[%c0_19, %c0_20] : memref<144x144xbf16, #tpu.memory_space<vmem>>, vector<144x144xbf16>
    %cst_21 = arith.constant dense<0.000000e+00> : vector<16x144xf32>
    %39 = tpu.matmul %29, %38, %cst_21 {dimension_numbers = #tpu.dot_dimension_numbers<[1], [0], [0], [1], [0, 0, 1, 1], [], []>} : vector<16x144xbf16>, vector<144x144xbf16>, vector<16x144xf32> -> vector<16x144xf32>
    %40 = arith.truncf %39 : vector<16x144xf32> to vector<16x144xbf16>
    %c0_22 = arith.constant 0 : index
    %c0_23 = arith.constant 0 : index
    %41 = vector.load %arg9[%c0_22, %c0_23] : memref<16x144xbf16, #tpu.memory_space<vmem>>, vector<16x144xbf16>
    tpu.vector_store %arg9[%c0_22, %c0_23], %40 {strides = array<i32>} : memref<16x144xbf16, #tpu.memory_space<vmem>>, vector<16x144xbf16>,
    return
  }
  func.func @transform_0(%arg0: i32) -> (i32, i32) {
    %c0_i32 = arith.constant 0 : i32
    %c0_i32_0 = arith.constant 0 : i32
    return %arg0, %c0_i32 : i32, i32
  }
  func.func @transform_1(%arg0: i32) -> (i32, i32) {
    %c0_i32 = arith.constant 0 : i32
    %c0_i32_0 = arith.constant 0 : i32
    %c0_i32_1 = arith.constant 0 : i32
    return %c0_i32, %c0_i32_0 : i32, i32
  }
  func.func @transform_2(%arg0: i32) -> (i32, i32) {
    %c0_i32 = arith.constant 0 : i32
    %c0_i32_0 = arith.constant 0 : i32
    %c0_i32_1 = arith.constant 0 : i32
    return %c0_i32, %c0_i32_0 : i32, i32
  }
  func.func @transform_3(%arg0: i32) -> (i32, i32) {
    %c0_i32 = arith.constant 0 : i32
    %c0_i32_0 = arith.constant 0 : i32
    %c0_i32_1 = arith.constant 0 : i32
    return %c0_i32, %c0_i32_0 : i32, i32
  }
  func.func @transform_4(%arg0: i32) -> (i32, i32) {
    %c0_i32 = arith.constant 0 : i32
    %c0_i32_0 = arith.constant 0 : i32
    %c0_i32_1 = arith.constant 0 : i32
    return %c0_i32, %c0_i32_0 : i32, i32
  }
  func.func @transform_5(%arg0: i32) -> (i32, i32) {
    %c0_i32 = arith.constant 0 : i32
    %c0_i32_0 = arith.constant 0 : i32
    %c0_i32_1 = arith.constant 0 : i32
    return %c0_i32, %c0_i32_0 : i32, i32
  }
  func.func @transform_6(%arg0: i32) -> (i32, i32) {
    %c0_i32 = arith.constant 0 : i32
    %c0_i32_0 = arith.constant 0 : i32
    return %arg0, %c0_i32 : i32, i32
  }
  func.func @transform_7(%arg0: i32) -> (i32, i32) {
    %c0_i32 = arith.constant 0 : i32
    %c0_i32_0 = arith.constant 0 : i32
    return %arg0, %c0_i32 : i32, i32
  }
  func.func @transform_8(%arg0: i32) -> (i32, i32) {
    %c0_i32 = arith.constant 0 : i32
    %c0_i32_0 = arith.constant 0 : i32
    return %arg0, %c0_i32 : i32, i32
  }
}

module attributes {stable_mosaic.version = 11 : i64} {
  func.func @attn_ffn_kernel(%arg0: i32, %arg1: memref<1x4x8x36xbf16, #tpu.memory_space<vmem>>, %arg2: memref<1x4x8x36xbf16, #tpu.memory_space<vmem>>, %arg3: memref<1x4x8x36xbf16, #tpu.memory_space<vmem>>, %arg4: memref<1x4x8x8xbf16, #tpu.memory_space<vmem>>, %arg5: memref<1x8x144xf32, #tpu.memory_space<vmem>>, %arg6: memref<4x36x144xbf16, #tpu.memory_space<vmem>>, %arg7: memref<1x144xf32, #tpu.memory_space<vmem>>, %arg8: memref<1x144xf32, #tpu.memory_space<vmem>>, %arg9: memref<1x144xf32, #tpu.memory_space<vmem>>, %arg10: memref<144x576xbf16, #tpu.memory_space<vmem>>, %arg11: memref<1x576xf32, #tpu.memory_space<vmem>>, %arg12: memref<576x144xbf16, #tpu.memory_space<vmem>>, %arg13: memref<1x144xf32, #tpu.memory_space<vmem>>, %arg14: memref<1x8x144xf32, #tpu.memory_space<vmem>>) attributes {dimension_semantics = [#tpu.dimension_semantics<parallel>], iteration_bounds = array<i64: 2>, scalar_prefetch = 0 : i64, scratch_operands = 0 : i64, tpu.core_type = #tpu.core_type<tc>, window_params = [{transform_indices = @transform_0, window_bounds = array<i64: 1, 4, 8, 36>}, {transform_indices = @transform_1, window_bounds = array<i64: 1, 4, 8, 36>}, {transform_indices = @transform_2, window_bounds = array<i64: 1, 4, 8, 36>}, {transform_indices = @transform_3, window_bounds = array<i64: 1, 4, 8, 8>}, {transform_indices = @transform_4, window_bounds = array<i64: 1, 8, 144>}, {pipeline_mode = #tpu.pipeline_mode<synchronous>, transform_indices = @transform_5, window_bounds = array<i64: 4, 36, 144>}, {pipeline_mode = #tpu.pipeline_mode<synchronous>, transform_indices = @transform_6, window_bounds = array<i64: 1, 144>}, {pipeline_mode = #tpu.pipeline_mode<synchronous>, transform_indices = @transform_7, window_bounds = array<i64: 1, 144>}, {pipeline_mode = #tpu.pipeline_mode<synchronous>, transform_indices = @transform_8, window_bounds = array<i64: 1, 144>}, {pipeline_mode = #tpu.pipeline_mode<synchronous>, transform_indices = @transform_9, window_bounds = array<i64: 144, 576>}, {pipeline_mode = #tpu.pipeline_mode<synchronous>, transform_indices = @transform_10, window_bounds = array<i64: 1, 576>}, {pipeline_mode = #tpu.pipeline_mode<synchronous>, transform_indices = @transform_11, window_bounds = array<i64: 576, 144>}, {pipeline_mode = #tpu.pipeline_mode<synchronous>, transform_indices = @transform_12, window_bounds = array<i64: 1, 144>}, {transform_indices = @transform_13, window_bounds = array<i64: 1, 8, 144>}]} {
    %0 = tpu.iota {dimensions = array<i32: 0>} : vector<8x8xi32>
    %1 = tpu.iota {dimensions = array<i32: 1>} : vector<8x8xi32>
    %2 = arith.cmpi sge, %0, %1 : vector<8x8xi32>
    %cst = arith.constant 0.000000e+00 : f32
    %3 = vector.broadcast %cst : f32 to vector<8x144xf32>
    %c0 = arith.constant 0 : index
    %c0_0 = arith.constant 0 : index
    %c0_1 = arith.constant 0 : index
    %c0_2 = arith.constant 0 : index
    %4 = vector.load %arg1[%c0, %c0_0, %c0_1, %c0_2] : memref<1x4x8x36xbf16, #tpu.memory_space<vmem>>, vector<1x1x8x36xbf16>
    %5 = vector.shape_cast %4 : vector<1x1x8x36xbf16> to vector<8x36xbf16>
    %c0_3 = arith.constant 0 : index
    %c0_4 = arith.constant 0 : index
    %c0_5 = arith.constant 0 : index
    %c0_6 = arith.constant 0 : index
    %6 = vector.load %arg2[%c0_3, %c0_4, %c0_5, %c0_6] : memref<1x4x8x36xbf16, #tpu.memory_space<vmem>>, vector<1x1x8x36xbf16>
    %7 = vector.shape_cast %6 : vector<1x1x8x36xbf16> to vector<8x36xbf16>
    %c0_7 = arith.constant 0 : index
    %c0_8 = arith.constant 0 : index
    %c0_9 = arith.constant 0 : index
    %c0_10 = arith.constant 0 : index
    %8 = vector.load %arg3[%c0_7, %c0_8, %c0_9, %c0_10] : memref<1x4x8x36xbf16, #tpu.memory_space<vmem>>, vector<1x1x8x36xbf16>
    %9 = vector.shape_cast %8 : vector<1x1x8x36xbf16> to vector<8x36xbf16>
    %cst_11 = arith.constant dense<0.000000e+00> : vector<8x8xf32>
    %10 = tpu.matmul %5, %7, %cst_11 {dimension_numbers = #tpu.dot_dimension_numbers<[1], [1], [0], [0], [0, 0, 1, 0], [], []>} : vector<8x36xbf16>, vector<8x36xbf16>, vector<8x8xf32> -> vector<8x8xf32>
    %c0_12 = arith.constant 0 : index
    %c0_13 = arith.constant 0 : index
    %c0_14 = arith.constant 0 : index
    %c0_15 = arith.constant 0 : index
    %11 = vector.load %arg4[%c0_12, %c0_13, %c0_14, %c0_15] : memref<1x4x8x8xbf16, #tpu.memory_space<vmem>>, vector<1x1x8x8xbf16>
    %12 = vector.shape_cast %11 : vector<1x1x8x8xbf16> to vector<8x8xbf16>
    %13 = arith.extf %12 : vector<8x8xbf16> to vector<8x8xf32>
    %14 = arith.addf %10, %13 : vector<8x8xf32>
    %cst_16 = arith.constant -1.000000e+30 : f32
    %15 = vector.broadcast %cst_16 : f32 to vector<8x8xf32>
    %16 = arith.select %2, %14, %15 : vector<8x8xi1>, vector<8x8xf32>
    %cst_17 = arith.constant dense<0xFF800000> : vector<8xf32>
    %17 = vector.multi_reduction <maximumf>, %16, %cst_17 [1] : vector<8x8xf32> to vector<8xf32>
    %18 = vector.shape_cast %17 : vector<8xf32> to vector<8x1xf32>
    %19 = vector.broadcast %18 : vector<8x1xf32> to vector<8x8xf32>
    %20 = arith.subf %16, %19 : vector<8x8xf32>
    %21 = math.exp %20 : vector<8x8xf32>
    %cst_18 = arith.constant dense<0.000000e+00> : vector<8xf32>
    %22 = vector.multi_reduction <add>, %21, %cst_18 [1] : vector<8x8xf32> to vector<8xf32>
    %23 = vector.shape_cast %22 : vector<8xf32> to vector<8x1xf32>
    %24 = tpu.reciprocal %23 {approx = true} : vector<8x1xf32> -> vector<8x1xf32>
    %25 = vector.broadcast %24 : vector<8x1xf32> to vector<8x8xf32>
    %26 = arith.mulf %21, %25 : vector<8x8xf32>
    %27 = arith.truncf %26 : vector<8x8xf32> to vector<8x8xbf16>
    %cst_19 = arith.constant dense<0.000000e+00> : vector<8x36xf32>
    %28 = tpu.matmul %27, %9, %cst_19 {dimension_numbers = #tpu.dot_dimension_numbers<[1], [0], [0], [1], [0, 0, 1, 1], [], []>} : vector<8x8xbf16>, vector<8x36xbf16>, vector<8x36xf32> -> vector<8x36xf32>
    %29 = arith.truncf %28 : vector<8x36xf32> to vector<8x36xbf16>
    %c0_20 = arith.constant 0 : index
    %c0_21 = arith.constant 0 : index
    %c0_22 = arith.constant 0 : index
    %30 = vector.load %arg6[%c0_20, %c0_21, %c0_22] : memref<4x36x144xbf16, #tpu.memory_space<vmem>>, vector<1x36x144xbf16>
    %31 = vector.shape_cast %30 : vector<1x36x144xbf16> to vector<36x144xbf16>
    %cst_23 = arith.constant dense<0.000000e+00> : vector<8x144xf32>
    %32 = tpu.matmul %29, %31, %cst_23 {dimension_numbers = #tpu.dot_dimension_numbers<[1], [0], [0], [1], [0, 0, 1, 1], [], []>} : vector<8x36xbf16>, vector<36x144xbf16>, vector<8x144xf32> -> vector<8x144xf32>
    %33 = arith.addf %3, %32 : vector<8x144xf32>
    %c0_24 = arith.constant 0 : index
    %c1 = arith.constant 1 : index
    %c0_25 = arith.constant 0 : index
    %c0_26 = arith.constant 0 : index
    %34 = vector.load %arg1[%c0_24, %c1, %c0_25, %c0_26] : memref<1x4x8x36xbf16, #tpu.memory_space<vmem>>, vector<1x1x8x36xbf16>
    %35 = vector.shape_cast %34 : vector<1x1x8x36xbf16> to vector<8x36xbf16>
    %c0_27 = arith.constant 0 : index
    %c1_28 = arith.constant 1 : index
    %c0_29 = arith.constant 0 : index
    %c0_30 = arith.constant 0 : index
    %36 = vector.load %arg2[%c0_27, %c1_28, %c0_29, %c0_30] : memref<1x4x8x36xbf16, #tpu.memory_space<vmem>>, vector<1x1x8x36xbf16>
    %37 = vector.shape_cast %36 : vector<1x1x8x36xbf16> to vector<8x36xbf16>
    %c0_31 = arith.constant 0 : index
    %c1_32 = arith.constant 1 : index
    %c0_33 = arith.constant 0 : index
    %c0_34 = arith.constant 0 : index
    %38 = vector.load %arg3[%c0_31, %c1_32, %c0_33, %c0_34] : memref<1x4x8x36xbf16, #tpu.memory_space<vmem>>, vector<1x1x8x36xbf16>
    %39 = vector.shape_cast %38 : vector<1x1x8x36xbf16> to vector<8x36xbf16>
    %cst_35 = arith.constant dense<0.000000e+00> : vector<8x8xf32>
    %40 = tpu.matmul %35, %37, %cst_35 {dimension_numbers = #tpu.dot_dimension_numbers<[1], [1], [0], [0], [0, 0, 1, 0], [], []>} : vector<8x36xbf16>, vector<8x36xbf16>, vector<8x8xf32> -> vector<8x8xf32>
    %c0_36 = arith.constant 0 : index
    %c1_37 = arith.constant 1 : index
    %c0_38 = arith.constant 0 : index
    %c0_39 = arith.constant 0 : index
    %41 = vector.load %arg4[%c0_36, %c1_37, %c0_38, %c0_39] : memref<1x4x8x8xbf16, #tpu.memory_space<vmem>>, vector<1x1x8x8xbf16>
    %42 = vector.shape_cast %41 : vector<1x1x8x8xbf16> to vector<8x8xbf16>
    %43 = arith.extf %42 : vector<8x8xbf16> to vector<8x8xf32>
    %44 = arith.addf %40, %43 : vector<8x8xf32>
    %cst_40 = arith.constant -1.000000e+30 : f32
    %45 = vector.broadcast %cst_40 : f32 to vector<8x8xf32>
    %46 = arith.select %2, %44, %45 : vector<8x8xi1>, vector<8x8xf32>
    %cst_41 = arith.constant dense<0xFF800000> : vector<8xf32>
    %47 = vector.multi_reduction <maximumf>, %46, %cst_41 [1] : vector<8x8xf32> to vector<8xf32>
    %48 = vector.shape_cast %47 : vector<8xf32> to vector<8x1xf32>
    %49 = vector.broadcast %48 : vector<8x1xf32> to vector<8x8xf32>
    %50 = arith.subf %46, %49 : vector<8x8xf32>
    %51 = math.exp %50 : vector<8x8xf32>
    %cst_42 = arith.constant dense<0.000000e+00> : vector<8xf32>
    %52 = vector.multi_reduction <add>, %51, %cst_42 [1] : vector<8x8xf32> to vector<8xf32>
    %53 = vector.shape_cast %52 : vector<8xf32> to vector<8x1xf32>
    %54 = tpu.reciprocal %53 {approx = true} : vector<8x1xf32> -> vector<8x1xf32>
    %55 = vector.broadcast %54 : vector<8x1xf32> to vector<8x8xf32>
    %56 = arith.mulf %51, %55 : vector<8x8xf32>
    %57 = arith.truncf %56 : vector<8x8xf32> to vector<8x8xbf16>
    %cst_43 = arith.constant dense<0.000000e+00> : vector<8x36xf32>
    %58 = tpu.matmul %57, %39, %cst_43 {dimension_numbers = #tpu.dot_dimension_numbers<[1], [0], [0], [1], [0, 0, 1, 1], [], []>} : vector<8x8xbf16>, vector<8x36xbf16>, vector<8x36xf32> -> vector<8x36xf32>
    %59 = arith.truncf %58 : vector<8x36xf32> to vector<8x36xbf16>
    %c1_44 = arith.constant 1 : index
    %c0_45 = arith.constant 0 : index
    %c0_46 = arith.constant 0 : index
    %60 = vector.load %arg6[%c1_44, %c0_45, %c0_46] : memref<4x36x144xbf16, #tpu.memory_space<vmem>>, vector<1x36x144xbf16>
    %61 = vector.shape_cast %60 : vector<1x36x144xbf16> to vector<36x144xbf16>
    %cst_47 = arith.constant dense<0.000000e+00> : vector<8x144xf32>
    %62 = tpu.matmul %59, %61, %cst_47 {dimension_numbers = #tpu.dot_dimension_numbers<[1], [0], [0], [1], [0, 0, 1, 1], [], []>} : vector<8x36xbf16>, vector<36x144xbf16>, vector<8x144xf32> -> vector<8x144xf32>
    %63 = arith.addf %33, %62 : vector<8x144xf32>
    %c0_48 = arith.constant 0 : index
    %c2 = arith.constant 2 : index
    %c0_49 = arith.constant 0 : index
    %c0_50 = arith.constant 0 : index
    %64 = vector.load %arg1[%c0_48, %c2, %c0_49, %c0_50] : memref<1x4x8x36xbf16, #tpu.memory_space<vmem>>, vector<1x1x8x36xbf16>
    %65 = vector.shape_cast %64 : vector<1x1x8x36xbf16> to vector<8x36xbf16>
    %c0_51 = arith.constant 0 : index
    %c2_52 = arith.constant 2 : index
    %c0_53 = arith.constant 0 : index
    %c0_54 = arith.constant 0 : index
    %66 = vector.load %arg2[%c0_51, %c2_52, %c0_53, %c0_54] : memref<1x4x8x36xbf16, #tpu.memory_space<vmem>>, vector<1x1x8x36xbf16>
    %67 = vector.shape_cast %66 : vector<1x1x8x36xbf16> to vector<8x36xbf16>
    %c0_55 = arith.constant 0 : index
    %c2_56 = arith.constant 2 : index
    %c0_57 = arith.constant 0 : index
    %c0_58 = arith.constant 0 : index
    %68 = vector.load %arg3[%c0_55, %c2_56, %c0_57, %c0_58] : memref<1x4x8x36xbf16, #tpu.memory_space<vmem>>, vector<1x1x8x36xbf16>
    %69 = vector.shape_cast %68 : vector<1x1x8x36xbf16> to vector<8x36xbf16>
    %cst_59 = arith.constant dense<0.000000e+00> : vector<8x8xf32>
    %70 = tpu.matmul %65, %67, %cst_59 {dimension_numbers = #tpu.dot_dimension_numbers<[1], [1], [0], [0], [0, 0, 1, 0], [], []>} : vector<8x36xbf16>, vector<8x36xbf16>, vector<8x8xf32> -> vector<8x8xf32>
    %c0_60 = arith.constant 0 : index
    %c2_61 = arith.constant 2 : index
    %c0_62 = arith.constant 0 : index
    %c0_63 = arith.constant 0 : index
    %71 = vector.load %arg4[%c0_60, %c2_61, %c0_62, %c0_63] : memref<1x4x8x8xbf16, #tpu.memory_space<vmem>>, vector<1x1x8x8xbf16>
    %72 = vector.shape_cast %71 : vector<1x1x8x8xbf16> to vector<8x8xbf16>
    %73 = arith.extf %72 : vector<8x8xbf16> to vector<8x8xf32>
    %74 = arith.addf %70, %73 : vector<8x8xf32>
    %cst_64 = arith.constant -1.000000e+30 : f32
    %75 = vector.broadcast %cst_64 : f32 to vector<8x8xf32>
    %76 = arith.select %2, %74, %75 : vector<8x8xi1>, vector<8x8xf32>
    %cst_65 = arith.constant dense<0xFF800000> : vector<8xf32>
    %77 = vector.multi_reduction <maximumf>, %76, %cst_65 [1] : vector<8x8xf32> to vector<8xf32>
    %78 = vector.shape_cast %77 : vector<8xf32> to vector<8x1xf32>
    %79 = vector.broadcast %78 : vector<8x1xf32> to vector<8x8xf32>
    %80 = arith.subf %76, %79 : vector<8x8xf32>
    %81 = math.exp %80 : vector<8x8xf32>
    %cst_66 = arith.constant dense<0.000000e+00> : vector<8xf32>
    %82 = vector.multi_reduction <add>, %81, %cst_66 [1] : vector<8x8xf32> to vector<8xf32>
    %83 = vector.shape_cast %82 : vector<8xf32> to vector<8x1xf32>
    %84 = tpu.reciprocal %83 {approx = true} : vector<8x1xf32> -> vector<8x1xf32>
    %85 = vector.broadcast %84 : vector<8x1xf32> to vector<8x8xf32>
    %86 = arith.mulf %81, %85 : vector<8x8xf32>
    %87 = arith.truncf %86 : vector<8x8xf32> to vector<8x8xbf16>
    %cst_67 = arith.constant dense<0.000000e+00> : vector<8x36xf32>
    %88 = tpu.matmul %87, %69, %cst_67 {dimension_numbers = #tpu.dot_dimension_numbers<[1], [0], [0], [1], [0, 0, 1, 1], [], []>} : vector<8x8xbf16>, vector<8x36xbf16>, vector<8x36xf32> -> vector<8x36xf32>
    %89 = arith.truncf %88 : vector<8x36xf32> to vector<8x36xbf16>
    %c2_68 = arith.constant 2 : index
    %c0_69 = arith.constant 0 : index
    %c0_70 = arith.constant 0 : index
    %90 = vector.load %arg6[%c2_68, %c0_69, %c0_70] : memref<4x36x144xbf16, #tpu.memory_space<vmem>>, vector<1x36x144xbf16>
    %91 = vector.shape_cast %90 : vector<1x36x144xbf16> to vector<36x144xbf16>
    %cst_71 = arith.constant dense<0.000000e+00> : vector<8x144xf32>
    %92 = tpu.matmul %89, %91, %cst_71 {dimension_numbers = #tpu.dot_dimension_numbers<[1], [0], [0], [1], [0, 0, 1, 1], [], []>} : vector<8x36xbf16>, vector<36x144xbf16>, vector<8x144xf32> -> vector<8x144xf32>
    %93 = arith.addf %63, %92 : vector<8x144xf32>
    %c0_72 = arith.constant 0 : index
    %c3 = arith.constant 3 : index
    %c0_73 = arith.constant 0 : index
    %c0_74 = arith.constant 0 : index
    %94 = vector.load %arg1[%c0_72, %c3, %c0_73, %c0_74] : memref<1x4x8x36xbf16, #tpu.memory_space<vmem>>, vector<1x1x8x36xbf16>
    %95 = vector.shape_cast %94 : vector<1x1x8x36xbf16> to vector<8x36xbf16>
    %c0_75 = arith.constant 0 : index
    %c3_76 = arith.constant 3 : index
    %c0_77 = arith.constant 0 : index
    %c0_78 = arith.constant 0 : index
    %96 = vector.load %arg2[%c0_75, %c3_76, %c0_77, %c0_78] : memref<1x4x8x36xbf16, #tpu.memory_space<vmem>>, vector<1x1x8x36xbf16>
    %97 = vector.shape_cast %96 : vector<1x1x8x36xbf16> to vector<8x36xbf16>
    %c0_79 = arith.constant 0 : index
    %c3_80 = arith.constant 3 : index
    %c0_81 = arith.constant 0 : index
    %c0_82 = arith.constant 0 : index
    %98 = vector.load %arg3[%c0_79, %c3_80, %c0_81, %c0_82] : memref<1x4x8x36xbf16, #tpu.memory_space<vmem>>, vector<1x1x8x36xbf16>
    %99 = vector.shape_cast %98 : vector<1x1x8x36xbf16> to vector<8x36xbf16>
    %cst_83 = arith.constant dense<0.000000e+00> : vector<8x8xf32>
    %100 = tpu.matmul %95, %97, %cst_83 {dimension_numbers = #tpu.dot_dimension_numbers<[1], [1], [0], [0], [0, 0, 1, 0], [], []>} : vector<8x36xbf16>, vector<8x36xbf16>, vector<8x8xf32> -> vector<8x8xf32>
    %c0_84 = arith.constant 0 : index
    %c3_85 = arith.constant 3 : index
    %c0_86 = arith.constant 0 : index
    %c0_87 = arith.constant 0 : index
    %101 = vector.load %arg4[%c0_84, %c3_85, %c0_86, %c0_87] : memref<1x4x8x8xbf16, #tpu.memory_space<vmem>>, vector<1x1x8x8xbf16>
    %102 = vector.shape_cast %101 : vector<1x1x8x8xbf16> to vector<8x8xbf16>
    %103 = arith.extf %102 : vector<8x8xbf16> to vector<8x8xf32>
    %104 = arith.addf %100, %103 : vector<8x8xf32>
    %cst_88 = arith.constant -1.000000e+30 : f32
    %105 = vector.broadcast %cst_88 : f32 to vector<8x8xf32>
    %106 = arith.select %2, %104, %105 : vector<8x8xi1>, vector<8x8xf32>
    %cst_89 = arith.constant dense<0xFF800000> : vector<8xf32>
    %107 = vector.multi_reduction <maximumf>, %106, %cst_89 [1] : vector<8x8xf32> to vector<8xf32>
    %108 = vector.shape_cast %107 : vector<8xf32> to vector<8x1xf32>
    %109 = vector.broadcast %108 : vector<8x1xf32> to vector<8x8xf32>
    %110 = arith.subf %106, %109 : vector<8x8xf32>
    %111 = math.exp %110 : vector<8x8xf32>
    %cst_90 = arith.constant dense<0.000000e+00> : vector<8xf32>
    %112 = vector.multi_reduction <add>, %111, %cst_90 [1] : vector<8x8xf32> to vector<8xf32>
    %113 = vector.shape_cast %112 : vector<8xf32> to vector<8x1xf32>
    %114 = tpu.reciprocal %113 {approx = true} : vector<8x1xf32> -> vector<8x1xf32>
    %115 = vector.broadcast %114 : vector<8x1xf32> to vector<8x8xf32>
    %116 = arith.mulf %111, %115 : vector<8x8xf32>
    %117 = arith.truncf %116 : vector<8x8xf32> to vector<8x8xbf16>
    %cst_91 = arith.constant dense<0.000000e+00> : vector<8x36xf32>
    %118 = tpu.matmul %117, %99, %cst_91 {dimension_numbers = #tpu.dot_dimension_numbers<[1], [0], [0], [1], [0, 0, 1, 1], [], []>} : vector<8x8xbf16>, vector<8x36xbf16>, vector<8x36xf32> -> vector<8x36xf32>
    %119 = arith.truncf %118 : vector<8x36xf32> to vector<8x36xbf16>
    %c3_92 = arith.constant 3 : index
    %c0_93 = arith.constant 0 : index
    %c0_94 = arith.constant 0 : index
    %120 = vector.load %arg6[%c3_92, %c0_93, %c0_94] : memref<4x36x144xbf16, #tpu.memory_space<vmem>>, vector<1x36x144xbf16>
    %121 = vector.shape_cast %120 : vector<1x36x144xbf16> to vector<36x144xbf16>
    %cst_95 = arith.constant dense<0.000000e+00> : vector<8x144xf32>
    %122 = tpu.matmul %119, %121, %cst_95 {dimension_numbers = #tpu.dot_dimension_numbers<[1], [0], [0], [1], [0, 0, 1, 1], [], []>} : vector<8x36xbf16>, vector<36x144xbf16>, vector<8x144xf32> -> vector<8x144xf32>
    %123 = arith.addf %93, %122 : vector<8x144xf32>
    %c0_96 = arith.constant 0 : index
    %c0_97 = arith.constant 0 : index
    %c0_98 = arith.constant 0 : index
    %124 = vector.load %arg5[%c0_96, %c0_97, %c0_98] : memref<1x8x144xf32, #tpu.memory_space<vmem>>, vector<1x8x144xf32>
    %125 = vector.shape_cast %124 : vector<1x8x144xf32> to vector<8x144xf32>
    %126 = arith.addf %125, %123 : vector<8x144xf32>
    %c0_99 = arith.constant 0 : index
    %c0_100 = arith.constant 0 : index
    %127 = vector.load %arg7[%c0_99, %c0_100] : memref<1x144xf32, #tpu.memory_space<vmem>>, vector<1x144xf32>
    %128 = vector.shape_cast %127 : vector<1x144xf32> to vector<144xf32>
    %129 = vector.shape_cast %128 : vector<144xf32> to vector<1x144xf32>
    %130 = vector.broadcast %129 : vector<1x144xf32> to vector<8x144xf32>
    %131 = arith.addf %126, %130 : vector<8x144xf32>
    %cst_101 = arith.constant dense<0.000000e+00> : vector<8xf32>
    %132 = vector.multi_reduction <add>, %131, %cst_101 [1] : vector<8x144xf32> to vector<8xf32>
    %133 = vector.shape_cast %132 : vector<8xf32> to vector<8x1xf32>
    %cst_102 = arith.constant 1.440000e+02 : f32
    %134 = vector.broadcast %cst_102 : f32 to vector<8x1xf32>
    %135 = arith.divf %133, %134 : vector<8x1xf32>
    %136 = vector.broadcast %135 : vector<8x1xf32> to vector<8x144xf32>
    %137 = arith.subf %131, %136 : vector<8x144xf32>
    %138 = arith.mulf %137, %137 : vector<8x144xf32>
    %cst_103 = arith.constant dense<0.000000e+00> : vector<8xf32>
    %139 = vector.multi_reduction <add>, %138, %cst_103 [1] : vector<8x144xf32> to vector<8xf32>
    %140 = vector.shape_cast %139 : vector<8xf32> to vector<8x1xf32>
    %cst_104 = arith.constant 1.440000e+02 : f32
    %141 = vector.broadcast %cst_104 : f32 to vector<8x1xf32>
    %142 = arith.divf %140, %141 : vector<8x1xf32>
    %143 = vector.broadcast %135 : vector<8x1xf32> to vector<8x144xf32>
    %144 = arith.subf %131, %143 : vector<8x144xf32>
    %cst_105 = arith.constant 9.99999974E-6 : f32
    %145 = vector.broadcast %cst_105 : f32 to vector<8x1xf32>
    %146 = arith.addf %142, %145 : vector<8x1xf32>
    %147 = math.rsqrt %146 : vector<8x1xf32>
    %148 = vector.broadcast %147 : vector<8x1xf32> to vector<8x144xf32>
    %149 = arith.mulf %144, %148 : vector<8x144xf32>
    %c0_106 = arith.constant 0 : index
    %c0_107 = arith.constant 0 : index
    %150 = vector.load %arg8[%c0_106, %c0_107] : memref<1x144xf32, #tpu.memory_space<vmem>>, vector<1x144xf32>
    %151 = vector.shape_cast %150 : vector<1x144xf32> to vector<144xf32>
    %152 = vector.shape_cast %151 : vector<144xf32> to vector<1x144xf32>
    %153 = vector.broadcast %152 : vector<1x144xf32> to vector<8x144xf32>
    %154 = arith.mulf %149, %153 : vector<8x144xf32>
    %c0_108 = arith.constant 0 : index
    %c0_109 = arith.constant 0 : index
    %155 = vector.load %arg9[%c0_108, %c0_109] : memref<1x144xf32, #tpu.memory_space<vmem>>, vector<1x144xf32>
    %156 = vector.shape_cast %155 : vector<1x144xf32> to vector<144xf32>
    %157 = vector.shape_cast %156 : vector<144xf32> to vector<1x144xf32>
    %158 = vector.broadcast %157 : vector<1x144xf32> to vector<8x144xf32>
    %159 = arith.addf %154, %158 : vector<8x144xf32>
    %160 = arith.truncf %159 : vector<8x144xf32> to vector<8x144xbf16>
    %c0_110 = arith.constant 0 : index
    %c0_111 = arith.constant 0 : index
    %161 = vector.load %arg10[%c0_110, %c0_111] : memref<144x576xbf16, #tpu.memory_space<vmem>>, vector<144x576xbf16>
    %cst_112 = arith.constant dense<0.000000e+00> : vector<8x576xf32>
    %162 = tpu.matmul %160, %161, %cst_112 {dimension_numbers = #tpu.dot_dimension_numbers<[1], [0], [0], [1], [0, 0, 1, 1], [], []>} : vector<8x144xbf16>, vector<144x576xbf16>, vector<8x576xf32> -> vector<8x576xf32>
    %c0_113 = arith.constant 0 : index
    %c0_114 = arith.constant 0 : index
    %163 = vector.load %arg11[%c0_113, %c0_114] : memref<1x576xf32, #tpu.memory_space<vmem>>, vector<1x576xf32>
    %164 = vector.shape_cast %163 : vector<1x576xf32> to vector<576xf32>
    %165 = vector.shape_cast %164 : vector<576xf32> to vector<1x576xf32>
    %166 = vector.broadcast %165 : vector<1x576xf32> to vector<8x576xf32>
    %167 = arith.addf %162, %166 : vector<8x576xf32>
    %cst_115 = arith.constant 0.000000e+00 : f32
    %168 = vector.broadcast %cst_115 : f32 to vector<8x576xf32>
    %169 = arith.maximumf %167, %168 : vector<8x576xf32>
    %170 = arith.truncf %169 : vector<8x576xf32> to vector<8x576xbf16>
    %c0_116 = arith.constant 0 : index
    %c0_117 = arith.constant 0 : index
    %171 = vector.load %arg12[%c0_116, %c0_117] : memref<576x144xbf16, #tpu.memory_space<vmem>>, vector<576x144xbf16>
    %cst_118 = arith.constant dense<0.000000e+00> : vector<8x144xf32>
    %172 = tpu.matmul %170, %171, %cst_118 {dimension_numbers = #tpu.dot_dimension_numbers<[1], [0], [0], [1], [0, 0, 1, 1], [], []>} : vector<8x576xbf16>, vector<576x144xbf16>, vector<8x144xf32> -> vector<8x144xf32>
    %c0_119 = arith.constant 0 : index
    %c0_120 = arith.constant 0 : index
    %173 = vector.load %arg13[%c0_119, %c0_120] : memref<1x144xf32, #tpu.memory_space<vmem>>, vector<1x144xf32>
    %174 = vector.shape_cast %173 : vector<1x144xf32> to vector<144xf32>
    %175 = vector.shape_cast %174 : vector<144xf32> to vector<1x144xf32>
    %176 = vector.broadcast %175 : vector<1x144xf32> to vector<8x144xf32>
    %177 = arith.addf %172, %176 : vector<8x144xf32>
    %178 = arith.addf %131, %177 : vector<8x144xf32>
    %c0_121 = arith.constant 0 : index
    %c0_122 = arith.constant 0 : index
    %c0_123 = arith.constant 0 : index
    %179 = vector.load %arg14[%c0_121, %c0_122, %c0_123] : memref<1x8x144xf32, #tpu.memory_space<vmem>>, vector<1x8x144xf32>
    %180 = vector.shape_cast %179 : vector<1x8x144xf32> to vector<8x144xf32>
    %181 = vector.shape_cast %178 : vector<8x144xf32> to vector<1x8x144xf32>
    tpu.vector_store %arg14[%c0_121, %c0_122, %c0_123], %181 {strides = array<i32>} : memref<1x8x144xf32, #tpu.memory_space<vmem>>, vector<1x8x144xf32>,
    return
  }
  func.func @transform_0(%arg0: i32) -> (i32, i32, i32, i32) {
    %c0_i32 = arith.constant 0 : i32
    %c0_i32_0 = arith.constant 0 : i32
    %c0_i32_1 = arith.constant 0 : i32
    %c0_i32_2 = arith.constant 0 : i32
    return %arg0, %c0_i32, %c0_i32_0, %c0_i32_1 : i32, i32, i32, i32
  }
  func.func @transform_1(%arg0: i32) -> (i32, i32, i32, i32) {
    %c0_i32 = arith.constant 0 : i32
    %c0_i32_0 = arith.constant 0 : i32
    %c0_i32_1 = arith.constant 0 : i32
    %c0_i32_2 = arith.constant 0 : i32
    return %arg0, %c0_i32, %c0_i32_0, %c0_i32_1 : i32, i32, i32, i32
  }
  func.func @transform_2(%arg0: i32) -> (i32, i32, i32, i32) {
    %c0_i32 = arith.constant 0 : i32
    %c0_i32_0 = arith.constant 0 : i32
    %c0_i32_1 = arith.constant 0 : i32
    %c0_i32_2 = arith.constant 0 : i32
    return %arg0, %c0_i32, %c0_i32_0, %c0_i32_1 : i32, i32, i32, i32
  }
  func.func @transform_3(%arg0: i32) -> (i32, i32, i32, i32) {
    %c0_i32 = arith.constant 0 : i32
    %c0_i32_0 = arith.constant 0 : i32
    %c0_i32_1 = arith.constant 0 : i32
    %c0_i32_2 = arith.constant 0 : i32
    return %arg0, %c0_i32, %c0_i32_0, %c0_i32_1 : i32, i32, i32, i32
  }
  func.func @transform_4(%arg0: i32) -> (i32, i32, i32) {
    %c0_i32 = arith.constant 0 : i32
    %c0_i32_0 = arith.constant 0 : i32
    %c0_i32_1 = arith.constant 0 : i32
    return %arg0, %c0_i32, %c0_i32_0 : i32, i32, i32
  }
  func.func @transform_5(%arg0: i32) -> (i32, i32, i32) {
    %c0_i32 = arith.constant 0 : i32
    %c0_i32_0 = arith.constant 0 : i32
    %c0_i32_1 = arith.constant 0 : i32
    %c0_i32_2 = arith.constant 0 : i32
    return %c0_i32, %c0_i32_0, %c0_i32_1 : i32, i32, i32
  }
  func.func @transform_6(%arg0: i32) -> (i32, i32) {
    %c0_i32 = arith.constant 0 : i32
    %c0_i32_0 = arith.constant 0 : i32
    %c0_i32_1 = arith.constant 0 : i32
    return %c0_i32, %c0_i32_0 : i32, i32
  }
  func.func @transform_7(%arg0: i32) -> (i32, i32) {
    %c0_i32 = arith.constant 0 : i32
    %c0_i32_0 = arith.constant 0 : i32
    %c0_i32_1 = arith.constant 0 : i32
    return %c0_i32, %c0_i32_0 : i32, i32
  }
  func.func @transform_8(%arg0: i32) -> (i32, i32) {
    %c0_i32 = arith.constant 0 : i32
    %c0_i32_0 = arith.constant 0 : i32
    %c0_i32_1 = arith.constant 0 : i32
    return %c0_i32, %c0_i32_0 : i32, i32
  }
  func.func @transform_9(%arg0: i32) -> (i32, i32) {
    %c0_i32 = arith.constant 0 : i32
    %c0_i32_0 = arith.constant 0 : i32
    %c0_i32_1 = arith.constant 0 : i32
    return %c0_i32, %c0_i32_0 : i32, i32
  }
  func.func @transform_10(%arg0: i32) -> (i32, i32) {
    %c0_i32 = arith.constant 0 : i32
    %c0_i32_0 = arith.constant 0 : i32
    %c0_i32_1 = arith.constant 0 : i32
    return %c0_i32, %c0_i32_0 : i32, i32
  }
  func.func @transform_11(%arg0: i32) -> (i32, i32) {
    %c0_i32 = arith.constant 0 : i32
    %c0_i32_0 = arith.constant 0 : i32
    %c0_i32_1 = arith.constant 0 : i32
    return %c0_i32, %c0_i32_0 : i32, i32
  }
  func.func @transform_12(%arg0: i32) -> (i32, i32) {
    %c0_i32 = arith.constant 0 : i32
    %c0_i32_0 = arith.constant 0 : i32
    %c0_i32_1 = arith.constant 0 : i32
    return %c0_i32, %c0_i32_0 : i32, i32
  }
  func.func @transform_13(%arg0: i32) -> (i32, i32, i32) {
    %c0_i32 = arith.constant 0 : i32
    %c0_i32_0 = arith.constant 0 : i32
    %c0_i32_1 = arith.constant 0 : i32
    return %arg0, %c0_i32, %c0_i32_0 : i32, i32, i32
  }
}

</mosaic_0001>

<bundles_post_ra>
// kernel: block_forward.2
= control target key start
LH: loop header
LB: loop body
LE: loop exit
PB: predicated region body
PF: predicated region fallthrough
CT: control target
= control target key end

     0   :  { %vm31_vm0 = vcmask 130048   ;;  %v920_v8 = vmov 144.0   ;;  %vm284_vm8 = vcmask 1043456   ;;  %vm285_vm9 = vcmask 130052   ;;  %s1383_s0 = inlined_call_operand.vmem [shape: f32[16,144], index: 0, kind: input, shape index: {}]   ;;  %s1384_s3 = inlined_call_operand.vmem [shape: bf16[144,144], index: 3, kind: input, shape index: {}]   ;;  %s1385_s4 = inlined_call_operand.vmem [shape: bf16[144,144], index: 4, kind: input, shape index: {}]   ;;  %s1386_s5 = inlined_call_operand.vmem [shape: bf16[144,144], index: 5, kind: input, shape index: {}]   ;;  %s1387_s1 = inlined_call_operand.vmem [shape: f32[1,144], index: 1, kind: input, shape index: {}]   ;;  %s1388_s2 = inlined_call_operand.vmem [shape: f32[1,144], index: 2, kind: input, shape index: {}]   ;;  %s1389_s6 = inlined_call_operand.vmem [shape: bf16[16,144], index: 6, kind: output, shape index: {0}]   ;;  %s1390_s8 = inlined_call_operand.vmem [shape: bf16[16,144], index: 8, kind: output, shape index: {2}]   ;;  %s1391_s7 = inlined_call_operand.vmem [shape: bf16[16,144], index: 7, kind: output, shape index: {1}]  }
   0x1   :  { %v27_v0 = vld [vmem:[%s1383_s0] sm:$0xff]  ;;  %v28_v1 = vld [vmem:[%s1383_s0 + $0x8] sm:$0xff]  ;;  %v30_v4 = vld [vmem:[%s1383_s0 + $0x18] sm:$0xff]  ;;  %914 = vrcp.f32 %v920_v8 }
   0x2   :  { %v32_v2 = vsel %vm31_vm0, %v28_v1, 0.0  ;;  %v29_v5 = vld [vmem:[%s1383_s0 + $0x10] sm:$0xff]  ;;  %v36_v6 = vsel %vm31_vm0, %v30_v4, 0.0  ;;  %v874_v13 = vld [vmem:[%s1384_s3 + $0x74] sm:$0xf0]  ;;  %vm1349_vm10 = vmor %vm285_vm9, %vm284_vm8 }
   0x3   :  { %v33_v3 = vadd.f32 %v32_v2, %v27_v0  ;;  %v37_v7 = vadd.f32 %v36_v6, %v29_v5  ;;  %v695_v12 = vld [vmem:[%s1384_s3 + $0x70] sm:$0xf]  ;;  %v873_v14 = vld [vmem:[%s1384_s3 + $0x74] sm:$0xf]  ;;  %v697_v16 = vld [vmem:[%s1384_s3 + $0x78] sm:$0xf0] }
   0x4   :  { %v696_v15 = vor.u32 %v874_v13, %v695_v12  ;;  %v687_v17 = vld [vmem:[%s1384_s3 + $0x60] sm:$0xf]  ;;  %v872_v18 = vld [vmem:[%s1384_s3 + $0x64] sm:$0xf0]  ;;  %v700_v19 = vor.u32 %v873_v14, %v697_v16  ;;  %v871_v20 = vld [vmem:[%s1384_s3 + $0x64] sm:$0xf] }
   0x5   :  { %34 = vadd.xlane.f32.xlu0 %v33_v3  ;;  %v689_v21 = vld [vmem:[%s1384_s3 + $0x68] sm:$0xf0]  ;;  %v688_v22 = vor.u32 %v872_v18, %v687_v17  ;;  %v679_v43 = vld [vmem:[%s1384_s3 + $0x50] sm:$0xf]  ;;  %v870_v44 = vld [vmem:[%s1384_s3 + $0x54] sm:$0xf0] }
   0x6   :  { %226 = vmatpush.bf16.msra.mxu0 %v696_v15  ;;  %254 = vmatpush.bf16.msra.mxu2 %v700_v19  ;;  %v692_v24 = vor.u32 %v871_v20, %v689_v21  ;;  %v869_v45 = vld [vmem:[%s1384_s3 + $0x54] sm:$0xf]  ;;  %v680_v46 = vor.u32 %v870_v44, %v679_v43  ;;  %v681_v47 = vld [vmem:[%s1384_s3 + $0x58] sm:$0xf0]  ;;  %v671_v49 = vld [vmem:[%s1384_s3 + $0x40] sm:$0xf] }
   0x7   :  { %v915_v9 = vpop.eup %914  ;;  %v684_v48 = vor.u32 %v869_v45, %v681_v47  ;;  %v868_v50 = vld [vmem:[%s1384_s3 + $0x44] sm:$0xf0]  ;;  %v867_v51 = vld [vmem:[%s1384_s3 + $0x44] sm:$0xf]  ;;  %v673_v53 = vld [vmem:[%s1384_s3 + $0x48] sm:$0xf0] }
   0x8   :  { %v41_v10 = vmul.f32 144.0, %v915_v9  ;;  %vm45_vm1 = vweird.f32 %v915_v9  ;;  %v672_v52 = vor.u32 %v868_v50, %v671_v49  ;;  %v676_v54 = vor.u32 %v867_v51, %v673_v53  ;;  %v663_v55 = vld [vmem:[%s1384_s3 + $0x30] sm:$0xf]  ;;  %v866_v56 = vld [vmem:[%s1384_s3 + $0x34] sm:$0xf0] }
   0x9   :  { %v865_v57 = vld [vmem:[%s1384_s3 + $0x34] sm:$0xf]  ;;  %v664_v58 = vor.u32 %v866_v56, %v663_v55  ;;  %v665_v59 = vld [vmem:[%s1384_s3 + $0x38] sm:$0xf0]  ;;  %v655_v61 = vld [vmem:[%s1384_s3 + $0x20] sm:$0xf] }
   0xa   :  { %v42_v11 = vsub.f32 1.0, %v41_v10  ;;  %227 = vmatpush.bf16.msra.mxu0 %v688_v22  ;;  %255 = vmatpush.bf16.msra.mxu2 %v692_v24  ;;  %v668_v60 = vor.u32 %v865_v57, %v665_v59  ;;  %v864_v62 = vld [vmem:[%s1384_s3 + $0x24] sm:$0xf0]  ;;  %v863_v63 = vld [vmem:[%s1384_s3 + $0x24] sm:$0xf] }
   0xb   :  { %v647_v3 = vld [vmem:[%s1384_s3 + $0x10] sm:$0xf]  ;;  %v860_v10 = vld [vmem:[%s1384_s3 + $0x4] sm:$0xf0]  ;;  %v859_v14 = vld [vmem:[%s1384_s3 + $0x4] sm:$0xf] }
   0xc   :  { %v43_v23 = vmul.f32 %v915_v9, %v42_v11  ;;  %v703_v11 = vld [vmem:[%s1384_s3 + $0x80] sm:$0xf]  ;;  %v876_v13 = vld [vmem:[%s1384_s3 + $0x84] sm:$0xf0]  ;;  %v641_v15 = vld [vmem:[%s1384_s3 + $0x8] sm:$0xf0] }
   0xd   :  { %38 = vadd.xlane.f32.xlu0 %v37_v7  ;;  %v649_v7 = vld [vmem:[%s1384_s3 + $0x18] sm:$0xf0]  ;;  %v704_v16 = vor.u32 %v876_v13, %v703_v11  ;;  %v644_v17 = vor.u32 %v859_v14, %v641_v15  ;;  %v769_v18 = vld [vmem:[%s1385_s4 + $0x70] sm:$0xf]  ;;  %v892_v19 = vld [vmem:[%s1385_s4 + $0x74] sm:$0xf0] }
   0xe   :  { %v44_v25 = vadd.f32 %v915_v9, %v43_v23  ;;  %228 = vmatpush.bf16.msra.mxu0 %v680_v46  ;;  %256 = vmatpush.bf16.msra.mxu2 %v684_v48  ;;  %v843_v20 = vld [vmem:[%s1386_s5 + $0x70] sm:$0xf]  ;;  %v770_v21 = vor.u32 %v892_v19, %v769_v18  ;;  %v910_v22 = vld [vmem:[%s1386_s5 + $0x74] sm:$0xf0]  ;;  %v909_v23 = vld [vmem:[%s1386_s5 + $0x74] sm:$0xf] }
   0xf   :  { %v845_v24 = vld [vmem:[%s1386_s5 + $0x78] sm:$0xf0]  ;;  %247 = vmatpush.bf16.msra.mxu1 %v704_v16  ;;  %v827_v43 = vld [vmem:[%s1386_s5 + $0x50] sm:$0xf]  ;;  %v906_v45 = vld [vmem:[%s1386_s5 + $0x54] sm:$0xf0] }
  0x10   :  { %v1004_v26 = vsel %vm45_vm1, %v915_v9, %v44_v25  ;;  %v639_v9 = vld [vmem:[%s1384_s3] sm:$0xf]  ;;  %v844_v25 = vor.u32 %v910_v22, %v843_v20  ;;  %v905_v46 = vld [vmem:[%s1386_s5 + $0x54] sm:$0xf]  ;;  %v829_v47 = vld [vmem:[%s1386_s5 + $0x58] sm:$0xf0]  ;;  %v828_v48 = vor.u32 %v906_v45, %v827_v43 }
  0x11   :  { %v640_v12 = vor.u32 %v860_v10, %v639_v9  ;;  %v832_v49 = vor.u32 %v905_v46, %v829_v47  ;;  %v705_v53 = vld [vmem:[%s1384_s3 + $0x88] sm:$0xf0]  ;;  %v886_v56 = vld [vmem:[%s1385_s4 + $0x44] sm:$0xf0]  ;;  %v819_v57 = vld [vmem:[%s1386_s5 + $0x40] sm:$0xf] }
  0x12   :  { %229 = vmatpush.bf16.msra.mxu0 %v672_v52  ;;  %257 = vmatpush.bf16.msra.mxu2 %v676_v54  ;;  %v875_v52 = vld [vmem:[%s1384_s3 + $0x84] sm:$0xf]  ;;  %v745_v54 = vld [vmem:[%s1385_s4 + $0x40] sm:$0xf]  ;;  %v901_v11 = vld [vmem:[%s1386_s5 + $0x34] sm:$0xf] }
  0x13   :  { %397 = vmatpush.bf16.msrb.mxu1 %v770_v21  ;;  %v708_v55 = vor.u32 %v875_v52, %v705_v53  ;;  %v729_v15 = vld [vmem:[%s1385_s4 + $0x20] sm:$0xf]  ;;  %v882_v16 = vld [vmem:[%s1385_s4 + $0x24] sm:$0xf0]  ;;  %v899_v22 = vld [vmem:[%s1386_s5 + $0x24] sm:$0xf] }
  0x14   :  { %v803_v18 = vld [vmem:[%s1386_s5 + $0x20] sm:$0xf]  ;;  %v878_v43 = vld [vmem:[%s1385_s4 + $0x4] sm:$0xf0] }
  0x15   :  { %275 = vmatpush.bf16.msra.mxu3 %v708_v55  ;;  %v787_v46 = vld [vmem:[%s1386_s5] sm:$0xf] }
  0x16   :  { %230 = vmatpush.bf16.msra.mxu0 %v664_v58  ;;  %258 = vmatpush.bf16.msra.mxu2 %v668_v60  ;;  %v904_v58 = vld [vmem:[%s1386_s5 + $0x44] sm:$0xf0]  ;;  %v746_v60 = vor.u32 %v886_v56, %v745_v54  ;;  %v93_v56 = vld [vmem:[%s1387_s1] sm:$0x3] }
  0x78   :  { %v35_v27 = vpop.xlane.xlu0 %34 }
  0x79   :  { %v47_v28 = vmul.f32 %v1004_v26, %v35_v27  ;;  %v848_v27 = vor.u32 %v909_v23, %v845_v24  ;;  %v805_v23 = vld [vmem:[%s1386_s5 + $0x28] sm:$0xf0] }
  0x7b   :  { %v1007_v29 = vsub.f32 %v27_v0, %v47_v28  ;;  %v1009_v30 = vsub.f32 %v28_v1, %v47_v28  ;;  %v656_v0 = vor.u32 %v864_v62, %v655_v61  ;;  %v657_v1 = vld [vmem:[%s1384_s3 + $0x28] sm:$0xf0]  ;;  %v761_v28 = vld [vmem:[%s1385_s4 + $0x60] sm:$0xf]  ;;  %v820_v61 = vor.u32 %v904_v58, %v819_v57  ;;  %v903_v62 = vld [vmem:[%s1386_s5 + $0x44] sm:$0xf] }
  0x7c   :  { %v660_v2 = vor.u32 %v863_v63, %v657_v1  ;;  %v821_v63 = vld [vmem:[%s1386_s5 + $0x48] sm:$0xf0]  ;;  %v777_v1 = vld [vmem:[%s1385_s4 + $0x80] sm:$0xf] }
  0x7d   :  { %v53_v31 = vmul.f32 %v1007_v29, %v1007_v29  ;;  %v54_v32 = vmul.f32 %v1009_v30, %v1009_v30  ;;  %231 = vmatpush.bf16.msra.mxu0 %v656_v0  ;;  %v824_v0 = vor.u32 %v903_v62, %v821_v63  ;;  %v96_v62 = vperm.slane %v93_v56, 1  ;;  %v103_v63 = vld [vmem:[%s1388_s2] sm:$0x3] }
  0x7e   :  { %259 = vmatpush.bf16.msra.mxu2 %v660_v2  ;;  %v894_v2 = vld [vmem:[%s1385_s4 + $0x84] sm:$0xf0] }
  0x7f   :  { %v57_v33 = vsel %vm31_vm0, %v54_v32, 0.0  ;;  %v835_v32 = vld [vmem:[%s1386_s5 + $0x60] sm:$0xf] }
  0x80   :  { %v39_v34 = vpop.xlane.xlu0 %38  ;;  %v58_v35 = vadd.f32 %v57_v33, %v53_v31  ;;  %v890_v31 = vld [vmem:[%s1385_s4 + $0x64] sm:$0xf0] }
  0x81   :  { %v48_v36 = vmul.f32 %v1004_v26, %v39_v34  ;;  %v762_v33 = vor.u32 %v890_v31, %v761_v28  ;;  %v908_v34 = vld [vmem:[%s1386_s5 + $0x64] sm:$0xf0]  ;;  %v880_v28 = vld [vmem:[%s1385_s4 + $0x14] sm:$0xf0] }
  0x82   :  { %59 = vadd.xlane.f32.xlu1 %v58_v35  ;;  %v907_v35 = vld [vmem:[%s1386_s5 + $0x64] sm:$0xf] }
  0x83   :  { %v1017_v37 = vsub.f32 %v29_v5, %v48_v36  ;;  %v1019_v38 = vsub.f32 %v30_v4, %v48_v36  ;;  %v862_v4 = vld [vmem:[%s1384_s3 + $0x14] sm:$0xf0]  ;;  %v861_v5 = vld [vmem:[%s1384_s3 + $0x14] sm:$0xf]  ;;  %v837_v36 = vld [vmem:[%s1386_s5 + $0x68] sm:$0xf0]  ;;  %398 = vmatpush.bf16.msrb.mxu1 %v762_v33 }
  0x84   :  { %v648_v6 = vor.u32 %v862_v4, %v647_v3  ;;  %v652_v8 = vor.u32 %v861_v5, %v649_v7  ;;  %v778_v3 = vor.u32 %v894_v2, %v777_v1  ;;  %v737_v4 = vld [vmem:[%s1385_s4 + $0x30] sm:$0xf]  ;;  %v884_v5 = vld [vmem:[%s1385_s4 + $0x34] sm:$0xf0]  ;;  %v105_v2 = vperm.slane %v103_v63, 0 }
  0x85   :  { %v55_v39 = vmul.f32 %v1017_v37, %v1017_v37  ;;  %v56_v40 = vmul.f32 %v1019_v38, %v1019_v38  ;;  %v811_v7 = vld [vmem:[%s1386_s5 + $0x30] sm:$0xf] }
  0x86   :  { %232 = vmatpush.bf16.msra.mxu0 %v648_v6  ;;  %260 = vmatpush.bf16.msra.mxu2 %v652_v8  ;;  %v738_v6 = vor.u32 %v884_v5, %v737_v4  ;;  %v902_v8 = vld [vmem:[%s1386_s5 + $0x34] sm:$0xf0]  ;;  %v795_v33 = vld [vmem:[%s1386_s5 + $0x10] sm:$0xf] }
  0x87   :  { %v61_v41 = vsel %vm31_vm0, %v56_v40, 0.0  ;;  %v840_v40 = vor.u32 %v907_v35, %v837_v36  ;;  %418 = vmatpush.bf16.msrb.mxu3 %v778_v3  ;;  %v812_v10 = vor.u32 %v902_v8, %v811_v7  ;;  %v897_v35 = vld [vmem:[%s1386_s5 + $0x14] sm:$0xf]  ;;  %v797_v36 = vld [vmem:[%s1386_s5 + $0x18] sm:$0xf0]  ;;  %v106_v3 = vperm.slane %v103_v63, 1 }
  0x88   :  { %v62_v42 = vadd.f32 %v61_v41, %v55_v39  ;;  %v836_v39 = vor.u32 %v908_v34, %v835_v32  ;;  %v753_v41 = vld [vmem:[%s1385_s4 + $0x50] sm:$0xf]  ;;  %v898_v34 = vld [vmem:[%s1386_s5 + $0x14] sm:$0xf0] }
  0x8a   :  { %63 = vadd.xlane.f32.xlu1 %v62_v42  ;;  %233 = vmatpush.bf16.msra.mxu0 %v640_v12  ;;  %v888_v42 = vld [vmem:[%s1385_s4 + $0x54] sm:$0xf0]  ;;  %v813_v12 = vld [vmem:[%s1386_s5 + $0x38] sm:$0xf0] }
  0x8b   :  { %261 = vmatpush.bf16.msra.mxu2 %v644_v17  ;;  %v754_v44 = vor.u32 %v888_v42, %v753_v41  ;;  %v816_v14 = vor.u32 %v901_v11, %v813_v12  ;;  %v730_v17 = vor.u32 %v882_v16, %v729_v15  ;;  %v800_v41 = vor.u32 %v897_v35, %v797_v36  ;;  %v713_v42 = vld [vmem:[%s1385_s4] sm:$0xf]  ;;  %v881_v36 = vld [vmem:[%s1385_s4 + $0x24] sm:$0xf] }
  0x8c   :  { %v714_v45 = vor.u32 %v878_v43, %v713_v42  ;;  %v851_v11 = vld [vmem:[%s1386_s5 + $0x80] sm:$0xf]  ;;  %v723_v42 = vld [vmem:[%s1385_s4 + $0x18] sm:$0xf0] }
  0x8d   :  { %399 = vmatpush.bf16.msrb.mxu1 %v754_v44 }
  0x8e   :  { %593 = vmatpush.bf16.msrb.mxu0 %v848_v27  ;;  %v721_v27 = vld [vmem:[%s1385_s4 + $0x10] sm:$0xf] }
  0x8f   :  { %565 = vmatpush.bf16.msrb.mxu2 %v844_v25  ;;  %v808_v25 = vor.u32 %v899_v22, %v805_v23  ;;  %v722_v32 = vor.u32 %v880_v28, %v721_v27  ;;  %v755_v22 = vld [vmem:[%s1385_s4 + $0x58] sm:$0xf0]  ;;  %v883_v28 = vld [vmem:[%s1385_s4 + $0x34] sm:$0xf] }
  0x91   :  { %400 = vmatpush.bf16.msrb.mxu1 %v746_v60 }
  0x92   :  { %594 = vmatpush.bf16.msrb.mxu0 %v840_v40  ;;  %v796_v40 = vor.u32 %v898_v34, %v795_v33  ;;  %v853_v33 = vld [vmem:[%s1386_s5 + $0x88] sm:$0xf0] }
  0x93   :  { %566 = vmatpush.bf16.msrb.mxu2 %v836_v39 }
  0x95   :  { %401 = vmatpush.bf16.msrb.mxu1 %v738_v6 }
  0x96   :  { %595 = vmatpush.bf16.msrb.mxu0 %v832_v49  ;;  %v895_v49 = vld [vmem:[%s1386_s5 + $0x4] sm:$0xf] }
  0x97   :  { %567 = vmatpush.bf16.msrb.mxu2 %v828_v48  ;;  %v896_v48 = vld [vmem:[%s1386_s5 + $0x4] sm:$0xf0] }
  0x98   :  { %v788_v53 = vor.u32 %v896_v48, %v787_v46  ;;  %v893_v46 = vld [vmem:[%s1385_s4 + $0x84] sm:$0xf] }
  0x99   :  { %402 = vmatpush.bf16.msrb.mxu1 %v730_v17 }
  0x9a   :  { %596 = vmatpush.bf16.msrb.mxu0 %v824_v0 }
  0x9b   :  { %568 = vmatpush.bf16.msrb.mxu2 %v820_v61  ;;  %v95_v61 = vperm.slane %v93_v56, 0 }
  0x9d   :  { %403 = vmatpush.bf16.msrb.mxu1 %v722_v32  ;;  %v911_v32 = vld [vmem:[%s1386_s5 + $0x84] sm:$0xf] }
  0x9e   :  { %597 = vmatpush.bf16.msrb.mxu0 %v816_v14  ;;  %v856_v35 = vor.u32 %v911_v32, %v853_v33 }
  0x9f   :  { %569 = vmatpush.bf16.msrb.mxu2 %v812_v10 }
  0xa1   :  { %404 = vmatpush.bf16.msrb.mxu1 %v714_v45  ;;  %v715_v45 = vld [vmem:[%s1385_s4 + $0x8] sm:$0xf0] }
  0xa2   :  { %598 = vmatpush.bf16.msrb.mxu0 %v808_v25  ;;  %v747_v25 = vld [vmem:[%s1385_s4 + $0x48] sm:$0xf0] }
  0xa6   :  { %599 = vmatpush.bf16.msrb.mxu0 %v800_v41  ;;  %v879_v41 = vld [vmem:[%s1385_s4 + $0x14] sm:$0xf] }
  0xa7   :  { %v726_v43 = vor.u32 %v879_v41, %v723_v42 }
  0xf5   :  { %v60_v50 = vpop.xlane.xlu1 %59 }
  0xf6   :  { %v65_v51 = vmul.f32 %v60_v50, %v1004_v26  ;;  %v789_v50 = vld [vmem:[%s1386_s5 + $0x8] sm:$0xf0] }
  0xf7   :  { %v792_v54 = vor.u32 %v895_v49, %v789_v50 }
  0xf8   :  { %v1177_v59 = vadd.f32 1e-05, %v65_v51 }
  0xf9   :  { %600 = vmatpush.bf16.msrb.mxu0 %v792_v54 }
  0xfa   :  { %916 = vrsqrt.f32 %v1177_v59  ;;  %vm75_vm3 = vweird.f32 %v1177_v59 }
  0xfd   :  { %v64_v9 = vpop.xlane.xlu1 %63 }
  0xfe   :  { %v66_v13 = vmul.f32 %v64_v9, %v1004_v26  ;;  %v900_v26 = vld [vmem:[%s1386_s5 + $0x24] sm:$0xf0] }
  0xff   :  { %v804_v21 = vor.u32 %v900_v26, %v803_v18  ;;  %v889_v26 = vld [vmem:[%s1385_s4 + $0x64] sm:$0xf] }
 0x100   :  { %v917_v19 = vpop.eup %916  ;;  %v68_v20 = vadd.f32 1e-05, %v66_v13 }
 0x101   :  { %v70_v24 = vmul.f32 %v917_v19, %v1177_v59  ;;  %570 = vmatpush.bf16.msrb.mxu2 %v804_v21  ;;  %vm76_vm2 = vweird.f32 %v917_v19  ;;  %v887_v21 = vld [vmem:[%s1385_s4 + $0x54] sm:$0xf] }
 0x102   :  { %918 = vrsqrt.f32 %v68_v20  ;;  %vm77_vm4 = vmor %vm75_vm3, %vm76_vm2  ;;  %vm85_vm6 = vweird.f32 %v68_v20  ;;  %v758_v23 = vor.u32 %v887_v21, %v755_v22 }
 0x103   :  { %v71_v31 = vmul.f32 %v917_v19, %v70_v24  ;;  %v885_v24 = vld [vmem:[%s1385_s4 + $0x44] sm:$0xf] }
 0x104   :  { %v750_v27 = vor.u32 %v885_v24, %v747_v25 }
 0x105   :  { %v72_v39 = vmul.f32 0.5, %v71_v31  ;;  %571 = vmatpush.bf16.msrb.mxu2 %v796_v40  ;;  %v739_v31 = vld [vmem:[%s1385_s4 + $0x38] sm:$0xf0] }
 0x106   :  { %v742_v34 = vor.u32 %v883_v28, %v739_v31 }
 0x107   :  { %v73_v44 = vsub.f32 1.5, %v72_v39  ;;  %v731_v39 = vld [vmem:[%s1385_s4 + $0x28] sm:$0xf0] }
 0x108   :  { %v919_v47 = vpop.eup %918  ;;  %v734_v40 = vor.u32 %v881_v36, %v731_v39 }
 0x109   :  { %v74_v51 = vmul.f32 %v917_v19, %v73_v44  ;;  %v80_v52 = vmul.f32 %v919_v47, %v68_v20  ;;  %572 = vmatpush.bf16.msrb.mxu2 %v788_v53  ;;  %vm86_vm5 = vweird.f32 %v919_v47  ;;  %v877_v44 = vld [vmem:[%s1385_s4 + $0x4] sm:$0xf] }
 0x10a   :  { %vm87_vm7 = vmor %vm85_vm6, %vm86_vm5  ;;  %v718_v48 = vor.u32 %v877_v44, %v715_v45 }
 0x10b   :  { %v81_v55 = vmul.f32 %v919_v47, %v80_v52  ;;  %v78_v57 = vsel %vm77_vm4, %v917_v19, %v74_v51  ;;  %v763_v19 = vld [vmem:[%s1385_s4 + $0x68] sm:$0xf0] }
 0x10c   :  { %v89_v59 = vmul.f32 %v78_v57, %v1007_v29  ;;  %v90_v0 = vmul.f32 %v78_v57, %v1009_v30  ;;  %v891_v29 = vld [vmem:[%s1385_s4 + $0x74] sm:$0xf]  ;;  %v771_v30 = vld [vmem:[%s1385_s4 + $0x78] sm:$0xf0]  ;;  %v766_v20 = vor.u32 %v889_v26, %v763_v19 }
 0x10d   :  { %v82_v58 = vmul.f32 0.5, %v81_v55  ;;  %v774_v17 = vor.u32 %v891_v29, %v771_v30 }
 0x10e   :  { %v99_v5 = vmul.f32 %v95_v61, %v89_v59  ;;  %v100_v6 = vmul.f32 %v96_v62, %v90_v0 }
 0x10f   :  { %v83_v60 = vsub.f32 1.5, %v82_v58 }
 0x110   :  { %v109_v12 = vadd.f32 %v105_v2, %v99_v5 }
 0x111   :  { %v84_v1 = vmul.f32 %v919_v47, %v83_v60 }
 0x113   :  { %v88_v4 = vsel %vm87_vm7, %v919_v47, %v84_v1  ;;  %v779_v47 = vld [vmem:[%s1385_s4 + $0x88] sm:$0xf0] }
 0x114   :  { %v91_v7 = vmul.f32 %v88_v4, %v1017_v37  ;;  %v92_v8 = vmul.f32 %v88_v4, %v1019_v38  ;;  %v912_v37 = vld [vmem:[%s1386_s5 + $0x84] sm:$0xf0]  ;;  %v110_v38 = vadd.f32 %v106_v3, %v100_v6  ;;  %v782_v49 = vor.u32 %v893_v46, %v779_v47 }
 0x115   :  { %v852_v18 = vor.u32 %v912_v37, %v851_v11 }
 0x116   :  { %v101_v9 = vmul.f32 %v95_v61, %v91_v7  ;;  %v102_v10 = vmul.f32 %v96_v62, %v92_v8 }
 0x118   :  { %v111_v13 = vadd.f32 %v105_v2, %v101_v9  ;;  %v112_v14 = vadd.f32 %v106_v3, %v102_v10 }
 0x11a   :  { %v113_v15 = vpack.c.bf16 %v111_v13, %v109_v12  ;;  %v114_v16 = vpack.c.bf16 %v112_v14, %v110_v38 }
 0x11c   :  { %234 = vmatmul.bf16.vlgmr.msra.gmra.mxu0 %v113_v15  ;;  %709 = vmatmul.msk.bf16.vlgmr.msra.gmra.mxu1 %vm31_vm0, %v114_v16 }
 0x11d   :  { %262 = vmatmul.bf16.vlgmr.msra.gmra.mxu2 %v113_v15  ;;  %710 = vmatmul.msk.bf16.vlgmr.msra.gmra.mxu3 %vm31_vm0, %v114_v16 }
 0x11e   :  { %425 = vmatpush.bf16.msra.mxu3 %v774_v17  ;;  %586 = vmatpush.bf16.msra.mxu1 %v852_v18 }
 0x122   :  { %426 = vmatpush.bf16.msra.mxu3 %v766_v20 }
 0x126   :  { %427 = vmatpush.bf16.msra.mxu3 %v758_v23 }
 0x12a   :  { %428 = vmatpush.bf16.msra.mxu3 %v750_v27 }
 0x12c   :  { %405 = vmatmul.bf16.vlgmr.msrb.gmra.mxu1 %v113_v15  ;;  %601 = vmatmul.bf16.vlgmr.msrb.gmra.mxu0 %v113_v15 }
 0x12d   :  { %783 = vmatmul.msk.bf16.vlgmr.msrb.gmra.mxu3 %vm31_vm0, %v114_v16  ;;  %573 = vmatmul.bf16.vlgmr.msrb.gmra.mxu2 %v113_v15 }
 0x12e   :  { %429 = vmatpush.bf16.msra.mxu3 %v742_v34  ;;  %614 = vmatpush.bf16.msrb.mxu1 %v856_v35 }
 0x132   :  { %430 = vmatpush.bf16.msra.mxu3 %v734_v40 }
 0x136   :  { %431 = vmatpush.bf16.msra.mxu3 %v726_v43 }
 0x13a   :  { %432 = vmatpush.bf16.msra.mxu3 %v718_v48 }
 0x13c   :  { %857 = vmatmul.msk.bf16.vlgmr.msra.gmra.mxu1 %vm31_vm0, %v114_v16 }
 0x13d   :  { %433 = vmatmul.bf16.vlgmr.msra.gmra.mxu3 %v113_v15 }
 0x13e   :  { %446 = vmatpush.bf16.msrb.mxu3 %v782_v49 }
 0x14c   :  { %858 = vmatmul.msk.bf16.vlgmr.msrb.gmra.mxu1 %vm31_vm0, %v114_v16 }
 0x14d   :  { %784 = vmatmul.msk.bf16.vlgmr.msrb.gmra.mxu3 %vm31_vm0, %v114_v16 }
 0x199   :  { %v249_v50 = vpop.f32.mrf.mxu1  ;;  %v235_v51 = vpop.f32.mrf.mxu0 }
 0x19a   :  { %v250_v54 = vadd.f32 %v249_v50, %v235_v51 }
 0x1a0   :  { %v263_v52 = vpop.f32.mrf.mxu2  ;;  %v277_v53 = vpop.f32.mrf.mxu3 }
 0x1a1   :  { %v278_v55 = vadd.f32 %v277_v53, %v263_v52  ;;  %v251_v56 = vpop.f32.mrf.mxu1  ;;  %v237_v60 = vpop.f32.mrf.mxu0 }
 0x1a2   :  { %v252_v63 = vadd.f32 %v251_v56, %v237_v60 }
 0x1a3   :  { %v282_v58 = vpack.c.bf16 %v278_v55, %v250_v54 }
 0x1a5   :  { %287 = vst.msk [vmem:[%s1389_s6] sm:$0xff] %vm1349_vm10, %v282_v58 }
 0x1a8   :  { %v265_v61 = vpop.f32.mrf.mxu2  ;;  %v279_v62 = vpop.f32.mrf.mxu3 }
 0x1a9   :  { %v280_v59 = vadd.f32 %v279_v62, %v265_v61  ;;  %v406_v0 = vpop.f32.mrf.mxu1  ;;  %v602_v8 = vpop.f32.mrf.mxu0 }
 0x1ab   :  { %v283_v1 = vpack.c.bf16 %v280_v59, %v252_v63 }
 0x1ad   :  { %288 = vst.msk [vmem:[%s1389_s6 + $0x8] sm:$0xff] %vm1349_vm10, %v283_v1 }
 0x1b0   :  { %v420_v2 = vpop.f32.mrf.mxu3  ;;  %v574_v9 = vpop.f32.mrf.mxu2 }
 0x1b1   :  { %v408_v3 = vpop.f32.mrf.mxu1  ;;  %v604_v12 = vpop.f32.mrf.mxu0  ;;  %v421_v13 = vadd.f32 %v420_v2, %v406_v0 }
 0x1b8   :  { %v422_v4 = vpop.f32.mrf.mxu3  ;;  %v576_v14 = vpop.f32.mrf.mxu2 }
 0x1b9   :  { %v588_v5 = vpop.f32.mrf.mxu1  ;;  %v423_v21 = vadd.f32 %v422_v4, %v408_v3 }
 0x1ba   :  { %v589_v30 = vadd.f32 %v588_v5, %v574_v9 }
 0x1c0   :  { %v434_v6 = vpop.f32.mrf.mxu3 }
 0x1c1   :  { %v590_v7 = vpop.f32.mrf.mxu1 }
 0x1c2   :  { %v591_v17 = vadd.f32 %v590_v7, %v576_v14 }
 0x1c8   :  { %v436_v10 = vpop.f32.mrf.mxu3 }
 0x1c9   :  { %v616_v29 = vpop.f32.mrf.mxu1 }
 0x1ca   :  { %v617_v11 = vadd.f32 %v616_v29, %v602_v8 }
 0x1cc   :  { %v621_v37 = vpack.c.bf16 %v617_v11, %v589_v30 }
 0x1ce   :  { %623 = vst.msk [vmem:[%s1390_s8] sm:$0xff] %vm1349_vm10, %v621_v37 }
 0x1d0   :  { %v448_v38 = vpop.f32.mrf.mxu3 }
 0x1d1   :  { %v449_v15 = vadd.f32 %v448_v38, %v434_v6  ;;  %v618_v16 = vpop.f32.mrf.mxu1 }
 0x1d2   :  { %v619_v18 = vadd.f32 %v618_v16, %v604_v12 }
 0x1d3   :  { %v453_v26 = vpack.c.bf16 %v449_v15, %v421_v13 }
 0x1d4   :  { %v622_v19 = vpack.c.bf16 %v619_v18, %v591_v17 }
 0x1d5   :  { %455 = vst.msk [vmem:[%s1391_s7] sm:$0xff] %vm1349_vm10, %v453_v26 }
 0x1d6   :  { %624 = vst.msk [vmem:[%s1390_s8 + $0x8] sm:$0xff] %vm1349_vm10, %v622_v19 }
 0x1d8   :  { %v450_v20 = vpop.f32.mrf.mxu3 }
 0x1d9   :  { %v451_v22 = vadd.f32 %v450_v20, %v436_v10 }
 0x1db   :  { %v454_v23 = vpack.c.bf16 %v451_v22, %v423_v21 }
 0x1dd   :  { %456 = vst.msk [vmem:[%s1391_s7 + $0x8] sm:$0xff] %vm1349_vm10, %v454_v23 }

// kernel: block_forward.3
= control target key start
LH: loop header
LB: loop body
LE: loop exit
PB: predicated region body
PF: predicated region fallthrough
CT: control target
= control target key end

     0   :  { %s4256_s0 = inlined_call_operand.vmem [shape: bf16[2,4,8,36], index: 0, kind: input, shape index: {}]   ;;  %s4257_s1 = inlined_call_operand.vmem [shape: bf16[2,4,8,36], index: 1, kind: input, shape index: {}]   ;;  %s4258_s2 = inlined_call_operand.vmem [shape: bf16[2,4,8,36], index: 2, kind: input, shape index: {}]   ;;  %s4259_s3 = inlined_call_operand.vmem [shape: bf16[2,4,8,8], index: 3, kind: input, shape index: {}]   ;;  %s4260_s4 = inlined_call_operand.vmem [shape: f32[2,8,144], index: 4, kind: input, shape index: {}]   ;;  %s4261_s5 = inlined_call_operand.vmem [shape: bf16[4,36,144], index: 5, kind: input, shape index: {}]   ;;  %s4262_s6 = inlined_call_operand.vmem [shape: f32[1,144], index: 6, kind: input, shape index: {}]   ;;  %s4263_s7 = inlined_call_operand.vmem [shape: f32[1,144], index: 7, kind: input, shape index: {}]   ;;  %s4264_s8 = inlined_call_operand.vmem [shape: f32[1,144], index: 8, kind: input, shape index: {}]   ;;  %s4265_s9 = inlined_call_operand.vmem [shape: bf16[144,576], index: 9, kind: input, shape index: {}]   ;;  %s4266_s10 = inlined_call_operand.vmem [shape: f32[1,576], index: 10, kind: input, shape index: {}]   ;;  %s4267_s11 = inlined_call_operand.vmem [shape: bf16[576,144], index: 11, kind: input, shape index: {}]   ;;  %s4268_s12 = inlined_call_operand.vmem [shape: f32[1,144], index: 12, kind: input, shape index: {}]   ;;  %s4269_s13 = inlined_call_operand.hbm [shape: f32[2,8,144], index: 13, kind: output, shape index: {}]  }
   0x1   :  { %4273 = sst [smem:[#allocation8_spill]] %s4256_s0 }
   0x2   :  { %4274 = sst [smem:[#allocation9_spill]] %s4257_s1 }
   0x3   :  { %4275 = sst [smem:[#allocation10_spill]] %s4258_s2 }
   0x4   :  { %4276 = sst [smem:[#allocation11_spill]] %s4259_s3 }
   0x5   :  { %18 = vsyncpa [#allocation3], 0 }
   0x6   :  { %20 = vsyncpa [#allocation3 + $0x1], 0  ;;  %s3180_s25 = smov 0   ;;  %s3182_s26 = smov 0  }
   0x7   :  { %s3184_s27 = smov 0   ;;  %s3186_s28 = smov 0  }
   0x8 LB: > { %4277 = sst [smem:[#allocation5_spill]] %s3103_s27  ;;  %s3201_s29 = sadd.s32 4294967295, %s3107_s28   ;;  %s3107_s28 = sphi %s3186_s28, %s4286_s28   ;;  %s3103_s27 = sphi %s3184_s27, %s4288_s27   ;;  %s3099_s26 = sphi %s3182_s26, %s4290_s26   ;;  %s3095_s25 = sphi %s3180_s25, %s4289_s25  }
   0x9   : > { %s2244_s30 = sadd.s32 4294967294, %s3107_s28   ;;  %s3205_s14 = sadd.s32 1, %s3107_s28  }
   0xa   : > { %4278 = sst [smem:[#allocation6_spill]] %s3205_s14  ;;  %s331_s15 = sadd.s32 1, %s3103_s27 }
   0xb   : > { %s328_s16 = ssub.s32 %s3107_s28, %s3205_s14  ;;  %p341_p0 = scmp.ne.s32.totalorder %s3103_s27, %s3099_s26 }
   0xc   : > { %p329_p1 = scmp.eq.s32.totalorder %s328_s16, 0  ;;  %p342_p2 = scmp.eq.s32.totalorder %s3201_s29, 1 }
   0xd   : > { %p347_p3 = scmp.ne.s32.totalorder %s3099_s26, %s3095_s25  ;;  %p348_p4 = scmp.eq.s32.totalorder %s2244_s30, 1 }
   0xe   : > { %s3216_s17 = scalar_select %p329_p1, %s3103_s27, %s331_s15  }
   0xf   : > { %p3218_p5 = por %p342_p2, %p341_p0  ;;  %p3222_p6 = por %p348_p4, %p347_p3 }
  0x10   : > { %4279 = sst [smem:[#allocation7_spill]] %s3216_s17  ;;  %p2247_p7 = scmp.ge.s32.totalorder %s3107_s28, 1 }
  0x11   : > { %p430_p8 = scmp.lt.s32.totalorder %s3107_s28, 3 }
  0x13   : > { %p431_p9 = pnand %p2247_p7, %p430_p8 }
  0x14   : > { %p494_p10 = scmp.lt.s32.totalorder (!%p431_p9), %s3201_s29, 1  ;;  %s4282_s1 = sld [smem:[#allocation9_spill]] (!%p431_p9) }
  0x15   : > { %434 = sbr.rel (%p431_p9) target bundleno = 1853 (0x73d), region = 72  ;;  %s4283_s0 = sld [smem:[#allocation8_spill]] (!%p431_p9) }
  0x16   : > { %s4284_s3 = sld [smem:[#allocation11_spill]] (!%p431_p9)  ;;  %s491_s22 = sand.u32 (!%p431_p9), 1, %s3099_s26  }
  0x17   : > { %s4285_s2 = sld [smem:[#allocation10_spill]] (!%p431_p9)  ;;  %s3065_s15 = scalar_lea.hbm (!%p431_p9), %s4269_s13, 32 }
  0x1a   : > { %s495_s20 = scalar_select %p494_p10, %s3201_s29, 1  ;;  %vm530_vm0 = vcmask 293888   ;;  %v520_v6 = vlaneseq  ;;  %vm551_vm2 = vcmask 64512   ;;  %vm567_vm3 = vcmask 1043456   ;;  %v589_v36 = vld [vmem:[%s4261_s5 + $0x20] sm:$0x33] }
  0x1b   : > { %v731_v37 = vunpack.c.l.b16 %v589_v36  ;;  %v732_v38 = vunpack.c.h.b16 %v589_v36  ;;  %vm685_vm4 = vcmask 1041408   ;;  %v2300_v39 = vld [vmem:[%s4261_s5 + $0x10] sm:$0xf]  ;;  %v2271_v40 = vld [vmem:[%s4261_s5 + $0x48] sm:$0x33]  ;;  %vm1048_vm5 = vcmask 130048  }
  0x1c   : > { %s3230_s21 = sshll.u32 %s495_s20, 4  ;;  %v3259_v8 = vshrl.u32 %v520_v6, 7  ;;  %v3261_v9 = vand.u32 127, %v520_v6  ;;  %v2854_v43 = vld [vmem:[%s4261_s5 + $0x14] sm:$0xf0]  ;;  %v670_v46 = vunpack.c.l.b16 %v2271_v40  ;;  %vm1982_vm10 = vcmask 523264  }
  0x1d   : > { %s3236_s24 = scalar_lea.vmem %s4282_s1, %s3230_s21  ;;  %s3246_s16 = scalar_lea.vmem %s4283_s0, %s3230_s21  ;;  %v737_v41 = vpack.c.b16 %v731_v37, %v731_v37  ;;  %v738_v42 = vpack.c.b16 %v732_v38, %v732_v38  ;;  %v2853_v44 = vld [vmem:[%s4261_s5 + $0x14] sm:$0xf]  ;;  %v2302_v45 = vld [vmem:[%s4261_s5 + $0x18] sm:$0xf0]  ;;  %v2301_v50 = vor.u32 %v2854_v43, %v2300_v39  ;;  %v2292_v61 = vld [vmem:[%s4261_s5] sm:$0xf] }
  0x1e   : > { %v526_v0 = vld [vmem:[%s3236_s24] sm:$0xf]  ;;  %v2262_v1 = vld [vmem:[%s3236_s24 + $0x4] sm:$0xf]  ;;  %s3256_s23 = scalar_lea.vmem %s4284_s3, %s3230_s21  ;;  %vm524_vm1 = vcmp.ge.s32.totalorder %v3259_v8, %v3261_v9  ;;  %s3279_s20 = scalar_lea.vmem %s4285_s2, %s3230_s21  ;;  %v676_v49 = vpack.c.b16 %v670_v46, %v670_v46  ;;  %v2305_v51 = vor.u32 %v2853_v44, %v2302_v45  ;;  %v2852_v62 = vld [vmem:[%s4261_s5 + $0x4] sm:$0xf0] }
  0x1f   : > { %v535_v2 = vsel %vm530_vm0, %v526_v0, 0  ;;  %v603_v3 = vsel %vm530_vm0, %v2262_v1, 0  ;;  %v525_v4 = vld [vmem:[%s3246_s16] sm:$0xf]  ;;  %v2261_v5 = vld [vmem:[%s3246_s16 + $0x4] sm:$0xf]  ;;  %v2293_v0 = vor.u32 %v2852_v62, %v2292_v61  ;;  %s518_s1 = scalar_lea.vmem %s4260_s4, %s3230_s21 }
  0x20   : > { %544 = vmatpush.bf16.xpose.msra.mxu0 %v535_v2  ;;  %612 = vmatpush.bf16.xpose.msra.mxu2 %v603_v3  ;;  %v528_v7 = vld [vmem:[%s3256_s23] sm:$0xff]   ;;  %v747_v47 = vsel %vm685_vm4, %v737_v41, 0  ;;  %v750_v48 = vsel %vm685_vm4, %v738_v42, 0  ;;  %v687_v52 = vsel %vm685_vm4, %v676_v49, 0  ;;  %v2294_v1 = vld [vmem:[%s4261_s5 + $0x8] sm:$0xf0]  ;;  %v671_v3 = vunpack.c.h.b16 %v2271_v40 }
  0x21   : > { %v529_v10 = vunpack.c.l.bf16 %v528_v7  ;;  %v598_v14 = vunpack.c.h.bf16 %v528_v7  ;;  %v527_v32 = vld [vmem:[%s3279_s20] sm:$0xf]  ;;  %v2263_v34 = vld [vmem:[%s3279_s20 + $0x4] sm:$0xf]  ;;  %v2282_v6 = vld [vmem:[%s4261_s5 + $0x38] sm:$0xf] }
  0x22   : > { %v569_v33 = vsel %vm567_vm3, %v527_v32, 0  ;;  %v635_v35 = vsel %vm567_vm3, %v2263_v34, 0  ;;  %v2851_v63 = vld [vmem:[%s4261_s5 + $0x4] sm:$0xf]  ;;  %v2858_v7 = vld [vmem:[%s4261_s5 + $0x3c] sm:$0xf0] }
  0x23   : > { %578 = vmatpush.bf16.msra.mxu1 %v569_v33  ;;  %644 = vmatpush.bf16.msra.mxu3 %v635_v35  ;;  %v2297_v2 = vor.u32 %v2851_v63, %v2294_v1  ;;  %v2311_v41 = vld [vmem:[%s3256_s23 + $0x8] sm:$0xff]   ;;  %s2984_s3 = sshll.u32 %s3201_s29, 4  ;;  %s2121_s29 = scalar_lea.sflag [#allocation3], %s491_s22 }
  0x24   : > { %v786_v42 = vunpack.c.l.bf16 %v2311_v41  ;;  %v915_v49 = vunpack.c.h.bf16 %v2311_v41  ;;  %v2339_v1 = vld [vmem:[%s3279_s20 + $0xc] sm:$0xf] }
  0x25   : > { %v2865_v41 = vld [vmem:[%s4261_s5 + $0x8c] sm:$0xf] }
  0x27   : > { %2259 = vmatmul.msk.bf16.vlgmr.msra.gmra.mxu0 %vm530_vm0, %v525_v4  ;;  %2265 = vmatmul.msk.bf16.vlgmr.msra.gmra.mxu2 %vm530_vm0, %v2261_v5  ;;  %v677_v4 = vpack.c.b16 %v671_v3, %v671_v3  ;;  %v2318_v3 = vld [vmem:[%s4261_s5 + $0x70] sm:$0x33] }
  0x28   : > { %757 = vmatpush.bf16.msrb.mxu0 %v747_v47  ;;  %770 = vmatpush.bf16.msrb.mxu2 %v750_v48 }
  0x29   : > { %697 = vmatpush.bf16.msrb.mxu1 %v687_v52  ;;  %v690_v5 = vsel %vm685_vm4, %v677_v4, 0  ;;  %v859_v4 = vunpack.c.h.b16 %v2318_v3 }
  0x2a   : > { %710 = vmatpush.bf16.msrb.mxu3 %v690_v5  ;;  %v858_v5 = vunpack.c.l.b16 %v2318_v3 }
  0x2c   : > { %758 = vmatpush.bf16.msrb.mxu0 %v2301_v50  ;;  %771 = vmatpush.bf16.msrb.mxu2 %v2305_v51 }
  0x30   : > { %759 = vmatpush.bf16.msrb.mxu0 %v2293_v0  ;;  %772 = vmatpush.bf16.msrb.mxu2 %v2297_v2  ;;  %v952_v2 = vsel %vm567_vm3, %v2339_v1, 0  ;;  %v1036_v1 = vld [vmem:[%s518_s1] sm:$0xff] }
  0xa4   : > { %v546_v11 = vpop.f32.mrf.mxu0 }
  0xa5   : > { %v547_v12 = vadd.f32 %v546_v11, %v529_v10  ;;  %v2283_v10 = vor.u32 %v2858_v7, %v2282_v6  ;;  %v2857_v11 = vld [vmem:[%s4261_s5 + $0x3c] sm:$0xf]  ;;  %v2861_v6 = vld [vmem:[%s4261_s5 + $0x64] sm:$0xf]  ;;  %v865_v7 = vpack.c.b16 %v859_v4, %v859_v4  ;;  %v1037_v4 = vld [vmem:[%s518_s1 + $0x8] sm:$0xff]  ;;  %s2248_s1 = sshll.u32 %s491_s22, 4 }
  0xa6   : > { %s493_s2 = scalar_lea.vmem [#allocation2], %s2248_s1 }
  0xa7   : > { %v550_v13 = vsel %vm524_vm1, %v547_v12, -1e+30  ;;  %v2284_v12 = vld [vmem:[%s4261_s5 + $0x40] sm:$0xf0]  ;;  %698 = vmatpush.bf16.msrb.mxu1 %v2283_v10  ;;  %v864_v10 = vpack.c.b16 %v858_v5, %v858_v5 }
  0xa8   : > { %v552_v15 = vsel %vm551_vm2, %v550_v13, -inf }
  0xa9   : > { %553 = vmax.xlane.f32.xlu1 %v552_v15  ;;  %v2856_v15 = vld [vmem:[%s4261_s5 + $0x2c] sm:$0xf0] }
  0xaa   : > { %v614_v16 = vpop.f32.mrf.mxu2 }
  0xab   : > { %v615_v17 = vadd.f32 %v614_v16, %v598_v14  ;;  %v2274_v14 = vld [vmem:[%s4261_s5 + $0x28] sm:$0xf] }
  0xac   : > { %v548_v18 = vpop.f32.mrf.mxu0  ;;  %v2275_v16 = vor.u32 %v2856_v15, %v2274_v14  ;;  %v877_v15 = vsel %vm685_vm4, %v865_v7, 0 }
  0xad   : > { %v618_v19 = vsel %vm524_vm1, %v615_v17, -1e+30  ;;  %v2855_v17 = vld [vmem:[%s4261_s5 + $0x2c] sm:$0xf]  ;;  %v2276_v18 = vld [vmem:[%s4261_s5 + $0x30] sm:$0xf0]  ;;  %897 = vmatpush.bf16.msra.mxu2 %v877_v15 }
  0xae   : > { %v619_v20 = vsel %vm551_vm2, %v618_v19, -inf  ;;  %699 = vmatpush.bf16.msrb.mxu1 %v2275_v16  ;;  %v874_v16 = vsel %vm685_vm4, %v864_v10, 0 }
  0xaf   : > { %620 = vmax.xlane.f32.xlu0 %v619_v20  ;;  %v2309_v20 = vld [vmem:[%s3236_s24 + $0x8] sm:$0xf]  ;;  %884 = vmatpush.bf16.msra.mxu0 %v874_v16  ;;  %v3109_v16 = vmov 144.0  }
  0xb2   : > { %v616_v21 = vpop.f32.mrf.mxu2 }
  0xb3   : > { %v791_v21 = vsel %vm530_vm0, %v2309_v20, 0  ;;  %v2323_v20 = vld [vmem:[%s4261_s5 + $0x58] sm:$0xf0] }
 0x11c   : > { %v554_v22 = vpop.xlane.xlu1 %553 }
 0x11d   : > { %v555_v23 = vsub.f32 %v550_v13, %v554_v22  ;;  %v2287_v13 = vor.u32 %v2857_v11, %v2284_v12  ;;  %v2331_v11 = vld [vmem:[%s4261_s5 + $0x68] sm:$0xf0]  ;;  %v2329_v12 = vld [vmem:[%s4261_s5 + $0x60] sm:$0xf] }
 0x11f   : > { %v556_v24 = vmul.f32 1.442695, %v555_v23  ;;  %711 = vmatpush.bf16.msrb.mxu3 %v2287_v13  ;;  %v2862_v13 = vld [vmem:[%s4261_s5 + $0x64] sm:$0xf0] }
 0x121   : > { %3025 = vpow2.f32 %v556_v24 }
 0x122   : > { %v621_v25 = vpop.xlane.xlu0 %620 }
 0x123   : > { %v622_v26 = vsub.f32 %v618_v19, %v621_v25  ;;  %v2279_v19 = vor.u32 %v2855_v17, %v2276_v18  ;;  %v2338_v25 = vld [vmem:[%s3236_s24 + $0xc] sm:$0xf]  ;;  %v2334_v17 = vor.u32 %v2861_v6, %v2331_v11  ;;  %v2330_v18 = vor.u32 %v2862_v13, %v2329_v12  ;;  %s2132_s24 = scalar_lea.hbm %s4269_s13, %s2984_s3 }
 0x124   : > { %s2136_s23 = sshll.u32 %s2132_s24, 4  ;;  %s2137_s23 = int_to_ptr.hbm [resolvable:$true] %s2136_s23 }
 0x125   : > { %v623_v27 = vmul.f32 1.442695, %v622_v26  ;;  %712 = vmatpush.bf16.msrb.mxu3 %v2279_v19  ;;  %v2859_v19 = vld [vmem:[%s4261_s5 + $0x54] sm:$0xf]  ;;  %898 = vmatpush.bf16.msra.mxu2 %v2334_v17  ;;  %v2508_v17 = vld [vmem:[%s4265_s9 + $0x118] sm:$0xf] }
 0x126   : > { %885 = vmatpush.bf16.msra.mxu0 %v2330_v18  ;;  %v2904_v18 = vld [vmem:[%s4265_s9 + $0x128] sm:$0xf0]  ;;  %s3059_s14 = sshra.s32 %s2137_s23, 4  ;;  %s3060_s14 = int_to_ptr.hbm [resolvable:$true] %s3059_s14 }
 0x127   : > { %v3026_v28 = vpop.eup %3025  ;;  %3027 = vpow2.f32 %v623_v27  ;;  %s3061_s17 = scalar_lea.hbm %s3060_s14, 16  ;;  %p3066_p0 = scmp.lt.s32.totalorder %s3060_s14, %s4269_s13 }
 0x128   : > { %v558_v29 = vsel %vm551_vm2, %v3026_v28, 0.0  ;;  %p3062_p11 = scmp.ne.s32.totalorder %s3060_s14, %s3061_s17  ;;  %p3067_p1 = scmp.lt.s32.totalorder %s3065_s15, %s3061_s17 }
 0x129   : > { %559 = vadd.xlane.f32.xlu1 %v558_v29 }
 0x12a   : > { %p3063_p12 = pnand %p3062_p11, %p3218_p5  ;;  %p3068_p2 = por %p3067_p1, %p3066_p0 }
 0x12c   : > { %p3064_p13 = pneg %p3063_p12 }
 0x12d   : > { %v3028_v30 = vpop.eup %3027 }
 0x12e   : > { %v625_v31 = vsel %vm551_vm2, %v3028_v30, 0.0  ;;  %p3069_p3 = pnand %p3068_p2, %p3064_p13 }
 0x12f   : > { %626 = vadd.xlane.f32.xlu0 %v625_v31  ;;  %v2337_v31 = vld [vmem:[%s3246_s16 + $0xc] sm:$0xf] }
 0x19c   : > { %v560_v53 = vpop.xlane.xlu1 %559 }
 0x19d   : > { %3029 = vrcp.f32 %v560_v53 }
 0x1a2   : > { %v627_v54 = vpop.xlane.xlu0 %626 }
 0x1a3   : > { %v3030_v55 = vpop.eup %3029  ;;  %3031 = vrcp.f32 %v627_v54 }
 0x1a4   : > { %v562_v56 = vmul.f32 %v3030_v55, %v3026_v28  ;;  %v920_v28 = vsel %vm530_vm0, %v2338_v25, 0  ;;  %v2310_v55 = vld [vmem:[%s3279_s20 + $0x8] sm:$0xf] }
 0x1a6   : > { %v563_v57 = vpack.c.bf16 %v562_v56, %v562_v56  ;;  %v823_v56 = vsel %vm567_vm3, %v2310_v55, 0 }
 0x1a8   : > { %2260 = vmatmul.msk.bf16.vlgmr.msra.gmra.mxu1 %vm551_vm2, %v563_v57 }
 0x1a9   : > { %v3032_v58 = vpop.eup %3031  ;;  %800 = vmatpush.bf16.xpose.msra.mxu1 %v791_v21  ;;  %v2326_v21 = vor.u32 %v2859_v19, %v2323_v20  ;;  %v2488_v19 = vld [vmem:[%s4265_s9 + $0xf0] sm:$0xf] }
 0x1aa   : > { %v629_v59 = vmul.f32 %v3032_v58, %v3028_v30  ;;  %v2308_v30 = vld [vmem:[%s3246_s16 + $0x8] sm:$0xf]  ;;  %s2134_s16 = sshll.u32 %s493_s2, 4  ;;  %s2135_s16 = int_to_ptr.vmem [resolvable:$true] %s2134_s16 }
 0x1ab   : > { %899 = vmatpush.bf16.msra.mxu2 %v2326_v21  ;;  %v2509_v21 = vor.u32 %v2904_v18, %v2508_v17  ;;  %v2877_v17 = vld [vmem:[%s4265_s9 + $0x54] sm:$0xf]  ;;  %v2410_v18 = vld [vmem:[%s4265_s9 + $0x64] sm:$0xf0] }
 0x1ac   : > { %v630_v60 = vpack.c.bf16 %v629_v59, %v629_v59 }
 0x1ae   : > { %2266 = vmatmul.msk.bf16.vlgmr.msra.gmra.mxu3 %vm551_vm2, %v630_v60 }
 0x1af   : > { %832 = vmatpush.bf16.msra.mxu3 %v823_v56 }
 0x225   : > { %v580_v22 = vpop.f32.mrf.mxu1 }
 0x226   : > { %v584_v23 = vpack.c.bf16 %v580_v22, %v580_v22 }
 0x228   : > { %2306 = vmatmul.msk.bf16.vlgmr.msrb.gmra.mxu0 %vm530_vm0, %v584_v23  ;;  %2307 = vmatmul.msk.bf16.vlgmr.msrb.gmra.mxu2 %vm530_vm0, %v584_v23 }
 0x22d   : > { %v582_v24 = vpop.f32.mrf.mxu1 }
 0x231   : > { %v646_v26 = vpop.f32.mrf.mxu3 }
 0x232   : > { %v650_v27 = vpack.c.bf16 %v646_v26, %v646_v26 }
 0x234   : > { %2288 = vmatmul.msk.bf16.vlgmr.msrb.gmra.mxu1 %vm530_vm0, %v650_v27  ;;  %2289 = vmatmul.msk.bf16.vlgmr.msrb.gmra.mxu3 %vm530_vm0, %v650_v27 }
 0x235   : > { %929 = vmatpush.bf16.xpose.msrb.mxu1 %v920_v28  ;;  %961 = vmatpush.bf16.msrb.mxu3 %v952_v2  ;;  %v1040_v2 = vld [vmem:[%s4262_s6] sm:$0x3] }
 0x236   : > { %v1043_v6 = vperm.slane %v1040_v2, 1  ;;  %v1042_v10 = vperm.slane %v1040_v2, 0  ;;  %v2528_v2 = vld [vmem:[%s4265_s9 + $0x140] sm:$0xf] }
 0x239   : > { %v648_v29 = vpop.f32.mrf.mxu3 }
 0x23a   : > { %v2321_v29 = vld [vmem:[%s4261_s5 + $0x50] sm:$0xf] }
 0x244   : > { %2312 = vmatmul.msk.bf16.vlgmr.msra.gmra.mxu1 %vm530_vm0, %v2308_v30  ;;  %v2860_v30 = vld [vmem:[%s4261_s5 + $0x54] sm:$0xf0] }
 0x245   : > { %1404 = vmatpush.bf16.msra.mxu1 %v2509_v21  ;;  %v2900_v21 = vld [vmem:[%s4265_s9 + $0x108] sm:$0xf0] }
 0x254   : > { %2341 = vmatmul.msk.bf16.vlgmr.msrb.gmra.mxu1 %vm530_vm0, %v2337_v31  ;;  %v2322_v31 = vor.u32 %v2860_v30, %v2321_v29 }
 0x256   : > { %886 = vmatpush.bf16.msra.mxu0 %v2322_v31 }
 0x2a5   : > { %v761_v32 = vpop.f32.mrf.mxu0 }
 0x2ab   : > { %v774_v33 = vpop.f32.mrf.mxu2 }
 0x2ad   : > { %v763_v34 = vpop.f32.mrf.mxu0 }
 0x2b1   : > { %v701_v35 = vpop.f32.mrf.mxu1 }
 0x2b2   : > { %v3357_v36 = vadd.f32 %v761_v32, %v701_v35  ;;  %v2347_v32 = vld [vmem:[%s4261_s5 + $0x98] sm:$0x33] }
 0x2b3   : > { %v776_v37 = vpop.f32.mrf.mxu2  ;;  %v987_v34 = vunpack.c.l.b16 %v2347_v32 }
 0x2b5   : > { %v993_v37 = vpack.c.b16 %v987_v34, %v987_v34 }
 0x2b7   : > { %v714_v38 = vpop.f32.mrf.mxu3 }
 0x2b8   : > { %v3359_v39 = vadd.f32 %v774_v33, %v714_v38  ;;  %v988_v33 = vunpack.c.h.b16 %v2347_v32  ;;  %v2448_v32 = vld [vmem:[%s4265_s9 + $0xa0] sm:$0xf] }
 0x2b9   : > { %v703_v40 = vpop.f32.mrf.mxu1 }
 0x2ba   : > { %v994_v35 = vpack.c.b16 %v988_v33, %v988_v33  ;;  %v1003_v40 = vsel %vm685_vm4, %v993_v37, 0  ;;  %v2889_v33 = vld [vmem:[%s4265_s9 + $0xb0] sm:$0xf0] }
 0x2bb   : > { %1013 = vmatpush.bf16.msrb.mxu0 %v1003_v40  ;;  %v2449_v34 = vor.u32 %v2889_v33, %v2448_v32  ;;  %v2478_v32 = vld [vmem:[%s4265_s9 + $0xe4] sm:$0xf0] }
 0x2bc   : > { %v1006_v38 = vsel %vm685_vm4, %v994_v35, 0 }
 0x2bd   : > { %1026 = vmatpush.bf16.msrb.mxu2 %v1006_v38 }
 0x2bf   : > { %v716_v43 = vpop.f32.mrf.mxu3 }
 0x2c0   : > { %v2358_v43 = vld [vmem:[%s4261_s5 + $0x88] sm:$0xf] }
 0x2c1   : > { %v802_v44 = vpop.f32.mrf.mxu1 }
 0x2c2   : > { %v803_v45 = vadd.f32 %v802_v44, %v786_v42  ;;  %v2360_v42 = vld [vmem:[%s4261_s5 + $0x90] sm:$0xf0] }
 0x2c3   : > { %v2363_v44 = vor.u32 %v2865_v41, %v2360_v42 }
 0x2c4   : > { %v806_v46 = vsel %vm524_vm1, %v803_v45, -1e+30  ;;  %v2866_v45 = vld [vmem:[%s4261_s5 + $0x8c] sm:$0xf0] }
 0x2c5   : > { %v807_v47 = vsel %vm551_vm2, %v806_v46, -inf  ;;  %1027 = vmatpush.bf16.msrb.mxu2 %v2363_v44 }
 0x2c6   : > { %808 = vmax.xlane.f32.xlu2 %v807_v47  ;;  %v2352_v47 = vld [vmem:[%s4261_s5 + $0x80] sm:$0xf0] }
 0x2c9   : > { %v804_v48 = vpop.f32.mrf.mxu1 }
 0x2ca   : > { %v2359_v48 = vor.u32 %v2866_v45, %v2358_v43 }
 0x2cc   : > { %1014 = vmatpush.bf16.msrb.mxu0 %v2359_v48  ;;  %v2428_v48 = vld [vmem:[%s4265_s9 + $0x78] sm:$0xf] }
 0x2d1   : > { %v931_v50 = vpop.f32.mrf.mxu1 }
 0x2d2   : > { %v932_v51 = vadd.f32 %v931_v50, %v915_v49  ;;  %v2350_v50 = vld [vmem:[%s4261_s5 + $0x78] sm:$0xf] }
 0x2d4   : > { %v935_v52 = vsel %vm524_vm1, %v932_v51, -1e+30  ;;  %v2864_v51 = vld [vmem:[%s4261_s5 + $0x7c] sm:$0xf0] }
 0x2d5   : > { %v936_v53 = vsel %vm551_vm2, %v935_v52, -inf }
 0x2d6   : > { %937 = vmax.xlane.f32.xlu2 %v936_v53 }
 0x2d9   : > { %v933_v54 = vpop.f32.mrf.mxu1 }
 0x339   : > { %v809_v57 = vpop.xlane.xlu2 %808 }
 0x33a   : > { %v810_v58 = vsub.f32 %v806_v46, %v809_v57  ;;  %v2863_v46 = vld [vmem:[%s4261_s5 + $0x7c] sm:$0xf] }
 0x33b   : > { %v2355_v49 = vor.u32 %v2863_v46, %v2352_v47 }
 0x33c   : > { %v811_v59 = vmul.f32 1.442695, %v810_v58 }
 0x33d   : > { %1028 = vmatpush.bf16.msrb.mxu2 %v2355_v49  ;;  %v2884_v49 = vld [vmem:[%s4265_s9 + $0x88] sm:$0xf0] }
 0x33e   : > { %3033 = vpow2.f32 %v811_v59 }
 0x344   : > { %v3034_v60 = vpop.eup %3033 }
 0x345   : > { %v813_v61 = vsel %vm551_vm2, %v3034_v60, 0.0 }
 0x346   : > { %814 = vadd.xlane.f32.xlu0 %v813_v61 }
 0x349   : > { %v938_v62 = vpop.xlane.xlu2 %937 }
 0x34a   : > { %v939_v8 = vsub.f32 %v935_v52, %v938_v62  ;;  %v2351_v52 = vor.u32 %v2864_v51, %v2350_v50  ;;  %v2429_v50 = vor.u32 %v2884_v49, %v2428_v48  ;;  %v2897_v51 = vld [vmem:[%s4265_s9 + $0xf4] sm:$0xf]  ;;  %v2888_v49 = vld [vmem:[%s4265_s9 + $0xac] sm:$0xf] }
 0x34c   : > { %v940_v9 = vmul.f32 1.442695, %v939_v8  ;;  %1015 = vmatpush.bf16.msrb.mxu0 %v2351_v52  ;;  %v2490_v52 = vld [vmem:[%s4265_s9 + $0x104] sm:$0xf0] }
 0x34e   : > { %3035 = vpow2.f32 %v940_v9 }
 0x354   : > { %v3036_v63 = vpop.eup %3035 }
 0x355   : > { %v942_v0 = vsel %vm551_vm2, %v3036_v63, 0.0 }
 0x356   : > { %943 = vadd.xlane.f32.xlu1 %v942_v0 }
 0x3b9   : > { %v815_v14 = vpop.xlane.xlu0 %814 }
 0x3ba   : > { %3037 = vrcp.f32 %v815_v14 }
 0x3c0   : > { %v3038_v22 = vpop.eup %3037 }
 0x3c1   : > { %v817_v23 = vmul.f32 %v3038_v22, %v3034_v60  ;;  %v2899_v22 = vld [vmem:[%s4265_s9 + $0x100] sm:$0xf0] }
 0x3c3   : > { %v818_v24 = vpack.c.bf16 %v817_v23, %v817_v23  ;;  %v2902_v23 = vld [vmem:[%s4265_s9 + $0x11c] sm:$0xf] }
 0x3c5   : > { %2313 = vmatmul.msk.bf16.vlgmr.msra.gmra.mxu3 %vm551_vm2, %v818_v24  ;;  %v2489_v24 = vor.u32 %v2899_v22, %v2488_v19  ;;  %v2496_v19 = vld [vmem:[%s4265_s9 + $0xf8] sm:$0xf]  ;;  %v2898_v22 = vld [vmem:[%s4265_s9 + $0xfc] sm:$0xf] }
 0x3c7   : > { %1405 = vmatpush.bf16.msra.mxu1 %v2489_v24  ;;  %v2497_v24 = vor.u32 %v2900_v21, %v2496_v19 }
 0x3c9   : > { %v944_v25 = vpop.xlane.xlu1 %943 }
 0x3ca   : > { %3039 = vrcp.f32 %v944_v25  ;;  %v2510_v25 = vld [vmem:[%s4265_s9 + $0x12c] sm:$0xf0] }
 0x3cb   : > { %3041 = vrcp.f32 %v3109_v16  ;;  %v2513_v29 = vor.u32 %v2902_v23, %v2510_v25  ;;  %v2498_v23 = vld [vmem:[%s4265_s9 + $0x10c] sm:$0xf0] }
 0x3cc   : > { %v2501_v25 = vor.u32 %v2898_v22, %v2498_v23 }
 0x3d0   : > { %v3040_v26 = vpop.eup %3039 }
 0x3d1   : > { %v946_v27 = vmul.f32 %v3040_v26, %v3036_v63  ;;  %v3042_v20 = vpop.eup %3041 }
 0x3d2   : > { %v1054_v26 = vmul.f32 144.0, %v3042_v20  ;;  %vm1058_vm6 = vweird.f32 %v3042_v20 }
 0x3d3   : > { %v947_v28 = vpack.c.bf16 %v946_v27, %v946_v27  ;;  %v2468_v27 = vld [vmem:[%s4265_s9 + $0xc8] sm:$0xf] }
 0x3d4   : > { %v1055_v31 = vsub.f32 1.0, %v1054_v26  ;;  %v2872_v26 = vld [vmem:[%s4265_s9 + $0x2c] sm:$0xf] }
 0x3d5   : > { %2342 = vmatmul.msk.bf16.vlgmr.msrb.gmra.mxu3 %vm551_vm2, %v947_v28  ;;  %v2894_v28 = vld [vmem:[%s4265_s9 + $0xd8] sm:$0xf0] }
 0x3d6   : > { %v2469_v30 = vor.u32 %v2894_v28, %v2468_v27  ;;  %v1056_v35 = vmul.f32 %v3042_v20, %v1055_v31  ;;  %v2390_v27 = vld [vmem:[%s4265_s9 + $0x3c] sm:$0xf0]  ;;  %v2476_v28 = vld [vmem:[%s4265_s9 + $0xd0] sm:$0xf]  ;;  %v2893_v31 = vld [vmem:[%s4265_s9 + $0xd4] sm:$0xf] }
 0x3d8   : > { %1406 = vmatpush.bf16.msra.mxu1 %v2469_v30  ;;  %v1057_v37 = vadd.f32 %v3042_v20, %v1056_v35  ;;  %v2895_v30 = vld [vmem:[%s4265_s9 + $0xe0] sm:$0xf0] }
 0x3d9   : > { %v2477_v33 = vor.u32 %v2895_v30, %v2476_v28  ;;  %v2907_v35 = vld [vmem:[%s4265_s9 + $0x144] sm:$0xf] }
 0x3da   : > { %v3486_v38 = vsel %vm1058_vm6, %v3042_v20, %v1057_v37  ;;  %v2413_v20 = vor.u32 %v2877_v17, %v2410_v18  ;;  %v2530_v37 = vld [vmem:[%s4265_s9 + $0x154] sm:$0xf0]  ;;  %v2538_v17 = vld [vmem:[%s4265_s9 + $0x15c] sm:$0xf0] }
 0x3dc   : > { %1407 = vmatpush.bf16.msra.mxu1 %v2449_v34  ;;  %v2481_v34 = vor.u32 %v2893_v31, %v2478_v32 }
 0x3e0   : > { %1408 = vmatpush.bf16.msra.mxu1 %v2429_v50  ;;  %v2458_v50 = vld [vmem:[%s4265_s9 + $0xbc] sm:$0xf0] }
 0x448   : > { %v834_v53 = vpop.f32.mrf.mxu3 }
 0x449   : > { %v838_v54 = vpack.c.bf16 %v834_v53, %v834_v53  ;;  %v2493_v53 = vor.u32 %v2897_v51, %v2490_v52  ;;  %v2461_v51 = vor.u32 %v2888_v49, %v2458_v50  ;;  %v2536_v52 = vld [vmem:[%s4265_s9 + $0x148] sm:$0xf]  ;;  %v2504_v50 = vld [vmem:[%s4265_s9 + $0x100] sm:$0xf] }
 0x44b   : > { %2335 = vmatmul.msk.bf16.vlgmr.msra.gmra.mxu0 %vm530_vm0, %v838_v54  ;;  %2336 = vmatmul.msk.bf16.vlgmr.msra.gmra.mxu2 %vm530_vm0, %v838_v54  ;;  %v2408_v54 = vld [vmem:[%s4265_s9 + $0x50] sm:$0xf] }
 0x44c   : > { %1430 = vmatpush.bf16.msra.mxu0 %v2513_v29  ;;  %v2393_v29 = vor.u32 %v2872_v26, %v2390_v27  ;;  %v1091_v27 = vld [vmem:[%s4264_s8] sm:$0x3] }
 0x450   : > { %v836_v55 = vpop.f32.mrf.mxu3  ;;  %1431 = vmatpush.bf16.msra.mxu0 %v2493_v53  ;;  %v2910_v53 = vld [vmem:[%s4265_s9 + $0x158] sm:$0xf0] }
 0x451   : > { %v2879_v55 = vld [vmem:[%s4265_s9 + $0x60] sm:$0xf0] }
 0x458   : > { %v963_v56 = vpop.f32.mrf.mxu3 }
 0x459   : > { %v967_v57 = vpack.c.bf16 %v963_v56, %v963_v56  ;;  %v2409_v56 = vor.u32 %v2879_v55, %v2408_v54  ;;  %v2537_v54 = vor.u32 %v2910_v53, %v2536_v52  ;;  %v2436_v55 = vld [vmem:[%s4265_s9 + $0x80] sm:$0xf]  ;;  %v2673_v52 = vld [vmem:[%s4267_s11 + $0xf0] sm:$0xf]  ;;  %v2943_v53 = vld [vmem:[%s4267_s11 + $0xf4] sm:$0xf0] }
 0x45b   : > { %2364 = vmatmul.msk.bf16.vlgmr.msrb.gmra.mxu0 %vm530_vm0, %v967_v57  ;;  %2365 = vmatmul.msk.bf16.vlgmr.msrb.gmra.mxu2 %vm530_vm0, %v967_v57  ;;  %v2892_v57 = vld [vmem:[%s4265_s9 + $0xcc] sm:$0xf] }
 0x45c   : > { %1409 = vmatpush.bf16.msra.mxu1 %v2409_v56  ;;  %v2885_v56 = vld [vmem:[%s4265_s9 + $0x90] sm:$0xf0] }
 0x460   : > { %v965_v58 = vpop.f32.mrf.mxu3 }
 0x461   : > { %v2470_v58 = vld [vmem:[%s4265_s9 + $0xdc] sm:$0xf0] }
 0x4c8   : > { %v888_v59 = vpop.f32.mrf.mxu0 }
 0x4c9   : > { %v905_v9 = vadd.f32 %v888_v59, %v3357_v36  ;;  %v2473_v59 = vor.u32 %v2892_v57, %v2470_v58  ;;  %v2883_v57 = vld [vmem:[%s4265_s9 + $0x84] sm:$0xf]  ;;  %v2437_v58 = vor.u32 %v2885_v56, %v2436_v55  ;;  %v2674_v56 = vor.u32 %v2943_v53, %v2673_v52  ;;  %v2625_v52 = vld [vmem:[%s4267_s11 + $0x90] sm:$0xf]  ;;  %v2931_v53 = vld [vmem:[%s4267_s11 + $0x94] sm:$0xf0] }
 0x4cb   : > { %1432 = vmatpush.bf16.msra.mxu0 %v2473_v59  ;;  %v2438_v59 = vld [vmem:[%s4265_s9 + $0x94] sm:$0xf0] }
 0x4ce   : > { %v901_v60 = vpop.f32.mrf.mxu2 }
 0x4cf   : > { %v906_v0 = vadd.f32 %v901_v60, %v3359_v39  ;;  %v2388_v60 = vld [vmem:[%s4265_s9 + $0x28] sm:$0xf] }
 0x4d0   : > { %v890_v61 = vpop.f32.mrf.mxu0 }
 0x4d1   : > { %v2874_v61 = vld [vmem:[%s4265_s9 + $0x38] sm:$0xf0] }
 0x4d6   : > { %v903_v62 = vpop.f32.mrf.mxu2 }
 0x4d7   : > { %v2389_v62 = vor.u32 %v2874_v61, %v2388_v60  ;;  %v2441_v61 = vor.u32 %v2883_v57, %v2438_v59  ;;  %v2941_v57 = vld [vmem:[%s4267_s11 + $0xe4] sm:$0xf0]  ;;  %v2896_v59 = vld [vmem:[%s4265_s9 + $0xe8] sm:$0xf0] }
 0x4d8   : > { %v1017_v8 = vpop.f32.mrf.mxu0 }
 0x4d9   : > { %v1034_v63 = vadd.f32 %v1017_v8, %v905_v9  ;;  %v2887_v8 = vld [vmem:[%s4265_s9 + $0xa4] sm:$0xf]  ;;  %v2450_v9 = vld [vmem:[%s4265_s9 + $0xb4] sm:$0xf0]  ;;  %1410 = vmatpush.bf16.msra.mxu1 %v2389_v62 }
 0x4db   : > { %v1038_v7 = vadd.f32 %v1036_v1, %v1034_v63  ;;  %v2453_v63 = vor.u32 %v2887_v8, %v2450_v9  ;;  %v2869_v1 = vld [vmem:[%s4265_s9 + $0x10] sm:$0xf0]  ;;  %v2416_v8 = vld [vmem:[%s4265_s9 + $0x58] sm:$0xf]  ;;  %v2880_v9 = vld [vmem:[%s4265_s9 + $0x68] sm:$0xf0] }
 0x4dd   : > { %v3451_v13 = vadd.f32 %v1042_v10, %v1038_v7  ;;  %1433 = vmatpush.bf16.msra.mxu0 %v2453_v63  ;;  %v2878_v63 = vld [vmem:[%s4265_s9 + $0x5c] sm:$0xf] }
 0x4de   : > { %v1030_v3 = vpop.f32.mrf.mxu2 }
 0x4df   : > { %v1035_v5 = vadd.f32 %v1030_v3, %v906_v0  ;;  %v2368_v0 = vld [vmem:[%s4265_s9] sm:$0xf] }
 0x4e0   : > { %v1019_v11 = vpop.f32.mrf.mxu0  ;;  %v2369_v3 = vor.u32 %v2869_v1, %v2368_v0  ;;  %v2417_v0 = vor.u32 %v2880_v9, %v2416_v8  ;;  %v2418_v1 = vld [vmem:[%s4265_s9 + $0x6c] sm:$0xf0]  ;;  %v2939_v9 = vld [vmem:[%s4267_s11 + $0xd4] sm:$0xf0] }
 0x4e1   : > { %v1039_v36 = vadd.f32 %v1037_v4, %v1035_v5  ;;  %v2909_v4 = vld [vmem:[%s4265_s9 + $0x150] sm:$0xf0]  ;;  %v2882_v5 = vld [vmem:[%s4265_s9 + $0x7c] sm:$0xf]  ;;  %v2516_v11 = vld [vmem:[%s4265_s9 + $0x120] sm:$0xf] }
 0x4e2   : > { %v2529_v7 = vor.u32 %v2909_v4, %v2528_v2  ;;  %1411 = vmatpush.bf16.msra.mxu1 %v2369_v3  ;;  %v2421_v2 = vor.u32 %v2878_v63, %v2418_v1  ;;  %v2396_v3 = vld [vmem:[%s4265_s9 + $0x30] sm:$0xf]  ;;  %v2875_v4 = vld [vmem:[%s4265_s9 + $0x40] sm:$0xf0]  ;;  %v2601_v1 = vld [vmem:[%s4267_s11 + $0x60] sm:$0xf] }
 0x4e3   : > { %v3449_v12 = vadd.f32 %v1043_v6, %v1039_v36  ;;  %v2430_v6 = vld [vmem:[%s4265_s9 + $0x8c] sm:$0xf0]  ;;  %v2905_v36 = vld [vmem:[%s4265_s9 + $0x130] sm:$0xf0] }
 0x4e4   : > { %v2433_v10 = vor.u32 %v2882_v5, %v2430_v6  ;;  %1424 = vmatpush.bf16.msra.mxu3 %v2529_v7  ;;  %v2873_v5 = vld [vmem:[%s4265_s9 + $0x34] sm:$0xf]  ;;  %v2397_v6 = vor.u32 %v2875_v4, %v2396_v3  ;;  %v2398_v7 = vld [vmem:[%s4265_s9 + $0x44] sm:$0xf0]  ;;  %v2657_v8 = vld [vmem:[%s4267_s11 + $0xd0] sm:$0xf] }
 0x4e5   : > { %v1049_v39 = vsel %vm1048_vm5, %v3449_v12, 0.0  ;;  %v2891_v3 = vld [vmem:[%s4265_s9 + $0xc0] sm:$0xf0] }
 0x4e6   : > { %v1032_v14 = vpop.f32.mrf.mxu2  ;;  %v1050_v15 = vadd.f32 %v1049_v39, %v3451_v13  ;;  %v2903_v39 = vld [vmem:[%s4265_s9 + $0x124] sm:$0xf]  ;;  %1434 = vmatpush.bf16.msra.mxu0 %v2433_v10  ;;  %v2401_v10 = vor.u32 %v2873_v5, %v2398_v7  ;;  %v2658_v5 = vor.u32 %v2939_v9, %v2657_v8  ;;  %v2923_v7 = vld [vmem:[%s4267_s11 + $0x54] sm:$0xf0]  ;;  %v2929_v8 = vld [vmem:[%s4267_s11 + $0x84] sm:$0xf0] }
 0x4e7   : > { %v2517_v14 = vor.u32 %v2905_v36, %v2516_v11  ;;  %v2376_v11 = vld [vmem:[%s4265_s9 + $0x8] sm:$0xf]  ;;  %v2870_v36 = vld [vmem:[%s4265_s9 + $0x18] sm:$0xf0] }
 0x4e8   : > { %1051 = vadd.xlane.f32.xlu2 %v1050_v15  ;;  %v2518_v15 = vld [vmem:[%s4265_s9 + $0x134] sm:$0xf0] }
 0x4e9   : > { %v2521_v16 = vor.u32 %v2903_v39, %v2518_v15  ;;  %1456 = vmatpush.bf16.msrb.mxu3 %v2517_v14  ;;  %v2868_v39 = vld [vmem:[%s4265_s9 + $0xc] sm:$0xf]  ;;  %v2377_v14 = vor.u32 %v2870_v36, %v2376_v11  ;;  %v2378_v15 = vld [vmem:[%s4265_s9 + $0x1c] sm:$0xf0]  ;;  %v2444_v11 = vld [vmem:[%s4265_s9 + $0x88] sm:$0xf] }
 0x4ea   : > { %1435 = vmatpush.bf16.msra.mxu0 %v2413_v20  ;;  %v2381_v19 = vor.u32 %v2868_v39, %v2378_v15  ;;  %v2886_v36 = vld [vmem:[%s4265_s9 + $0x98] sm:$0xf0]  ;;  %v2649_v39 = vld [vmem:[%s4267_s11 + $0xc0] sm:$0xf]  ;;  %v2737_v15 = vld [vmem:[%s4267_s11 + $0x170] sm:$0xf] }
 0x4eb   : > { %1482 = vmatpush.bf16.msrb.mxu1 %v2521_v16  ;;  %v2908_v16 = vld [vmem:[%s4265_s9 + $0x14c] sm:$0xf] }
 0x4ec   : > { %v2541_v20 = vor.u32 %v2908_v16, %v2538_v17  ;;  %v2959_v17 = vld [vmem:[%s4267_s11 + $0x174] sm:$0xf0] }
 0x4ed   : > { %1457 = vmatpush.bf16.msrb.mxu3 %v2497_v24  ;;  %v1083_v24 = vld [vmem:[%s4263_s7] sm:$0x3] }
 0x4ee   : > { %1436 = vmatpush.bf16.msra.mxu0 %v2393_v29  ;;  %v1085_v28 = vperm.slane %v1083_v24, 0  ;;  %v1086_v29 = vperm.slane %v1083_v24, 1  ;;  %v2641_v24 = vld [vmem:[%s4267_s11 + $0xb0] sm:$0xf] }
 0x4ef   : > { %1483 = vmatpush.bf16.msrb.mxu1 %v2501_v25 }
 0x4f1   : > { %1458 = vmatpush.bf16.msrb.mxu3 %v2477_v33  ;;  %v1093_v33 = vperm.slane %v1091_v27, 0 }
 0x4f3   : > { %1484 = vmatpush.bf16.msrb.mxu1 %v2481_v34  ;;  %v1094_v34 = vperm.slane %v1091_v27, 1  ;;  %v2729_v27 = vld [vmem:[%s4267_s11 + $0x160] sm:$0xf] }
 0x4f7   : > { %1485 = vmatpush.bf16.msrb.mxu1 %v2461_v51  ;;  %v2901_v51 = vld [vmem:[%s4265_s9 + $0x110] sm:$0xf0] }
 0x4f8   : > { %v2505_v55 = vor.u32 %v2901_v51, %v2504_v50  ;;  %v2801_v51 = vld [vmem:[%s4267_s11 + $0x1f0] sm:$0xf] }
 0x4fb   : > { %1486 = vmatpush.bf16.msrb.mxu1 %v2441_v61  ;;  %v2609_v61 = vld [vmem:[%s4267_s11 + $0x70] sm:$0xf] }
 0x4ff   : > { %1487 = vmatpush.bf16.msrb.mxu1 %v2421_v2  ;;  %v2464_v2 = vld [vmem:[%s4265_s9 + $0xb0] sm:$0xf] }
 0x503   : > { %1488 = vmatpush.bf16.msrb.mxu1 %v2401_v10  ;;  %v2465_v10 = vor.u32 %v2891_v3, %v2464_v2 }
 0x507   : > { %1489 = vmatpush.bf16.msrb.mxu1 %v2381_v19  ;;  %v2921_v19 = vld [vmem:[%s4267_s11 + $0x44] sm:$0xf0] }
 0x55b   : > { %v1052_v40 = vpop.xlane.xlu2 %1051 }
 0x55c   : > { %v1060_v41 = vmul.f32 %v3486_v38, %v1052_v40  ;;  %v2867_v40 = vld [vmem:[%s4265_s9 + $0x4] sm:$0xf] }
 0x55e   : > { %v3490_v42 = vsub.f32 %v3451_v13, %v1060_v41  ;;  %v3493_v43 = vsub.f32 %v3449_v12, %v1060_v41  ;;  %v2533_v41 = vor.u32 %v2907_v35, %v2530_v37 }
 0x560   : > { %v1063_v44 = vmul.f32 %v3490_v42, %v3490_v42  ;;  %v1064_v45 = vmul.f32 %v3493_v43, %v3493_v43  ;;  %1450 = vmatpush.bf16.msra.mxu2 %v2533_v41  ;;  %v2906_v41 = vld [vmem:[%s4265_s9 + $0x138] sm:$0xf0] }
 0x562   : > { %v1065_v46 = vsel %vm1048_vm5, %v1064_v45, 0.0  ;;  %v2456_v45 = vld [vmem:[%s4265_s9 + $0xa8] sm:$0xf] }
 0x563   : > { %v1066_v47 = vadd.f32 %v1065_v46, %v1063_v44  ;;  %v2370_v44 = vld [vmem:[%s4265_s9 + $0x14] sm:$0xf0]  ;;  %v2890_v46 = vld [vmem:[%s4265_s9 + $0xb8] sm:$0xf0] }
 0x564   : > { %v2457_v48 = vor.u32 %v2890_v46, %v2456_v45  ;;  %1476 = vmatpush.bf16.msrb.mxu2 %v2537_v54  ;;  %v2665_v54 = vld [vmem:[%s4267_s11 + $0xe0] sm:$0xf] }
 0x565   : > { %1067 = vadd.xlane.f32.xlu0 %v1066_v47  ;;  %v2373_v47 = vor.u32 %v2867_v40, %v2370_v44  ;;  %v2524_v40 = vld [vmem:[%s4265_s9 + $0x128] sm:$0xf]  ;;  %v2544_v44 = vld [vmem:[%s4265_s9 + $0x150] sm:$0xf] }
 0x566   : > { %1459 = vmatpush.bf16.msrb.mxu3 %v2457_v48  ;;  %v2525_v48 = vor.u32 %v2906_v41, %v2524_v40  ;;  %v2933_v40 = vld [vmem:[%s4267_s11 + $0xa4] sm:$0xf0] }
 0x567   : > { %1437 = vmatpush.bf16.msra.mxu0 %v2373_v47 }
 0x56a   : > { %1460 = vmatpush.bf16.msrb.mxu3 %v2437_v58  ;;  %v2484_v58 = vld [vmem:[%s4265_s9 + $0xd8] sm:$0xf] }
 0x56b   : > { %1502 = vmatpush.bf16.msrb.mxu0 %v2541_v20  ;;  %v2445_v20 = vor.u32 %v2886_v36, %v2444_v11  ;;  %v2769_v11 = vld [vmem:[%s4267_s11 + $0x1b0] sm:$0xf] }
 0x56e   : > { %1461 = vmatpush.bf16.msrb.mxu3 %v2417_v0  ;;  %v2485_v0 = vor.u32 %v2896_v59, %v2484_v58  ;;  %v2626_v59 = vor.u32 %v2931_v53, %v2625_v52 }
 0x572   : > { %1462 = vmatpush.bf16.msrb.mxu3 %v2397_v6  ;;  %v2593_v6 = vld [vmem:[%s4267_s11 + $0x50] sm:$0xf] }
 0x573   : > { %v2594_v16 = vor.u32 %v2923_v7, %v2593_v6  ;;  %v2777_v7 = vld [vmem:[%s4267_s11 + $0x1c0] sm:$0xf] }
 0x576   : > { %1463 = vmatpush.bf16.msrb.mxu3 %v2377_v14  ;;  %v2937_v14 = vld [vmem:[%s4267_s11 + $0xc4] sm:$0xf0] }
 0x5d8   : > { %v1068_v60 = vpop.xlane.xlu0 %1067 }
 0x5d9   : > { %v1069_v62 = vmul.f32 %v1068_v60, %v3486_v38  ;;  %v2666_v60 = vor.u32 %v2941_v57, %v2665_v54  ;;  %v2953_v57 = vld [vmem:[%s4267_s11 + $0x144] sm:$0xf0] }
 0x5db   : > { %v1070_v38 = vadd.f32 1e-05, %v1069_v62  ;;  %v2927_v62 = vld [vmem:[%s4267_s11 + $0x74] sm:$0xf0] }
 0x5dc   : > { %v2610_v63 = vor.u32 %v2927_v62, %v2609_v61  ;;  %v2793_v61 = vld [vmem:[%s4267_s11 + $0x1e0] sm:$0xf] }
 0x5dd   : > { %3043 = vrsqrt.f32 %v1070_v38  ;;  %vm1077_vm8 = vweird.f32 %v1070_v38  ;;  %v2617_v62 = vld [vmem:[%s4267_s11 + $0x80] sm:$0xf] }
 0x5e3   : > { %v3044_v18 = vpop.eup %3043 }
 0x5e4   : > { %v1072_v21 = vmul.f32 %v3044_v18, %v1070_v38  ;;  %vm1078_vm7 = vweird.f32 %v3044_v18  ;;  %v2925_v38 = vld [vmem:[%s4267_s11 + $0x64] sm:$0xf0] }
 0x5e5   : > { %vm1079_vm9 = vmor %vm1077_vm8, %vm1078_vm7  ;;  %v2602_v4 = vor.u32 %v2925_v38, %v2601_v1  ;;  %v2611_v1 = vld [vmem:[%s4267_s11 + $0x78] sm:$0xf0]  ;;  %v2618_v38 = vor.u32 %v2929_v8, %v2617_v62  ;;  %v2681_v62 = vld [vmem:[%s4267_s11 + $0x100] sm:$0xf] }
 0x5e6   : > { %v1073_v22 = vmul.f32 %v3044_v18, %v1072_v21  ;;  %v2424_v21 = vld [vmem:[%s4265_s9 + $0x60] sm:$0xf]  ;;  %v2945_v8 = vld [vmem:[%s4267_s11 + $0x104] sm:$0xf0] }
 0x5e8   : > { %v1074_v23 = vmul.f32 0.5, %v1073_v22  ;;  %v2881_v22 = vld [vmem:[%s4265_s9 + $0x70] sm:$0xf0] }
 0x5ea   : > { %v1075_v25 = vsub.f32 1.5, %v1074_v23  ;;  %v2650_v23 = vor.u32 %v2937_v14, %v2649_v39  ;;  %v2761_v39 = vld [vmem:[%s4267_s11 + $0x1a0] sm:$0xf]  ;;  %v2965_v14 = vld [vmem:[%s4267_s11 + $0x1a4] sm:$0xf0] }
 0x5ec   : > { %v1076_v26 = vmul.f32 %v3044_v18, %v1075_v25  ;;  %v2935_v25 = vld [vmem:[%s4267_s11 + $0xb4] sm:$0xf0] }
 0x5ee   : > { %v1080_v30 = vsel %vm1079_vm9, %v3044_v18, %v1076_v26  ;;  %v2585_v18 = vld [vmem:[%s4267_s11 + $0x40] sm:$0xf]  ;;  %v2738_v26 = vor.u32 %v2959_v17, %v2737_v15  ;;  %v2762_v15 = vor.u32 %v2965_v14, %v2761_v39  ;;  %v2917_v17 = vld [vmem:[%s4267_s11 + $0x24] sm:$0xf0]  ;;  %v2914_v14 = vld [vmem:[%s4267_s11 + $0x14] sm:$0xf] }
 0x5ef   : > { %v1081_v31 = vmul.f32 %v1080_v30, %v3490_v42  ;;  %v1082_v32 = vmul.f32 %v1080_v30, %v3493_v43  ;;  %v2911_v42 = vld [vmem:[%s4265_s9 + $0x160] sm:$0xf0]  ;;  %v2577_v30 = vld [vmem:[%s4267_s11 + $0x30] sm:$0xf] }
 0x5f0   : > { %v2545_v49 = vor.u32 %v2911_v42, %v2544_v44  ;;  %v2721_v42 = vld [vmem:[%s4267_s11 + $0x150] sm:$0xf] }
 0x5f1   : > { %v1089_v35 = vmul.f32 %v1085_v28, %v1081_v31  ;;  %v1090_v37 = vmul.f32 %v1086_v29, %v1082_v32  ;;  %v2586_v28 = vor.u32 %v2921_v19, %v2585_v18  ;;  %v2957_v29 = vld [vmem:[%s4267_s11 + $0x164] sm:$0xf0]  ;;  %v2919_v31 = vld [vmem:[%s4267_s11 + $0x34] sm:$0xf0]  ;;  %v2425_v32 = vor.u32 %v2881_v22, %v2424_v21  ;;  %v2924_v19 = vld [vmem:[%s4267_s11 + $0x64] sm:$0xf] }
 0x5f2   : > { %v2730_v41 = vor.u32 %v2957_v29, %v2729_v27  ;;  %v2578_v44 = vor.u32 %v2919_v31, %v2577_v30  ;;  %v2705_v21 = vld [vmem:[%s4267_s11 + $0x130] sm:$0xf]  ;;  %v2915_v29 = vld [vmem:[%s4267_s11 + $0x14] sm:$0xf0]  ;;  %v2922_v30 = vld [vmem:[%s4267_s11 + $0x54] sm:$0xf] }
 0x5f3   : > { %v1097_v43 = vadd.f32 %v1093_v33, %v1089_v35  ;;  %v1098_v45 = vadd.f32 %v1094_v34, %v1090_v37  ;;  %v2404_v33 = vld [vmem:[%s4265_s9 + $0x38] sm:$0xf]  ;;  %v2642_v34 = vor.u32 %v2935_v25, %v2641_v24  ;;  %v2876_v35 = vld [vmem:[%s4265_s9 + $0x48] sm:$0xf0]  ;;  %v2633_v37 = vld [vmem:[%s4267_s11 + $0xa0] sm:$0xf] }
 0x5f4   : > { %v2634_v50 = vor.u32 %v2933_v40, %v2633_v37  ;;  %v2753_v24 = vld [vmem:[%s4267_s11 + $0x190] sm:$0xf]  ;;  %v2963_v25 = vld [vmem:[%s4267_s11 + $0x194] sm:$0xf0]  ;;  %v2745_v40 = vld [vmem:[%s4267_s11 + $0x180] sm:$0xf] }
 0x5f5   : > { %v3707_v46 = vpack.c.bf16 %v1097_v43, %v1097_v43  ;;  %v3709_v47 = vpack.c.bf16 %v1098_v45, %v1098_v45  ;;  %v2955_v43 = vld [vmem:[%s4267_s11 + $0x154] sm:$0xf0]  ;;  %v2405_v45 = vor.u32 %v2876_v35, %v2404_v33  ;;  %v2754_v27 = vor.u32 %v2963_v25, %v2753_v24  ;;  %v2697_v33 = vld [vmem:[%s4267_s11 + $0x120] sm:$0xf]  ;;  %v2659_v24 = vld [vmem:[%s4267_s11 + $0xd8] sm:$0xf0] }
 0x5f6   : > { %v2722_v54 = vor.u32 %v2955_v43, %v2721_v42  ;;  %v2553_v42 = vld [vmem:[%s4267_s11] sm:$0xf]  ;;  %v2913_v43 = vld [vmem:[%s4267_s11 + $0x4] sm:$0xf0] }
 0x5f7   : > { %1412 = vmatmul.bf16.vlgmr.msra.gmra.mxu1 %v3707_v46  ;;  %2546 = vmatmul.msk.bf16.vlgmr.msra.gmra.mxu3 %vm1048_vm5, %v3709_v47 }
 0x5f8   : > { %1438 = vmatmul.bf16.vlgmr.msra.gmra.mxu0 %v3707_v46  ;;  %2547 = vmatmul.msk.bf16.vlgmr.msra.gmra.mxu2 %vm1048_vm5, %v3709_v47 }
 0x5f9   : > { %1508 = vmatpush.bf16.msra.mxu2 %v2525_v48  ;;  %1528 = vmatpush.bf16.msra.mxu3 %v2545_v49  ;;  %v2384_v48 = vld [vmem:[%s4265_s9 + $0x10] sm:$0xf]  ;;  %v2871_v49 = vld [vmem:[%s4265_s9 + $0x20] sm:$0xf0] }
 0x5fa   : > { %1999 = vmatpush.bf16.msra.mxu1 %v2674_v56  ;;  %1986 = vmatpush.bf16.msra.mxu0 %v2610_v63  ;;  %v2713_v56 = vld [vmem:[%s4267_s11 + $0x140] sm:$0xf]  ;;  %v2385_v58 = vor.u32 %v2871_v49, %v2384_v48  ;;  %v2973_v63 = vld [vmem:[%s4267_s11 + $0x1e4] sm:$0xf0]  ;;  %v2554_v48 = vor.u32 %v2913_v43, %v2553_v42  ;;  %v2587_v49 = vld [vmem:[%s4267_s11 + $0x48] sm:$0xf0] }
 0x5fb   : > { %v2714_v9 = vor.u32 %v2953_v57, %v2713_v56  ;;  %v2794_v2 = vor.u32 %v2973_v63, %v2793_v61  ;;  %v2918_v57 = vld [vmem:[%s4267_s11 + $0x34] sm:$0xf]  ;;  %v2795_v61 = vld [vmem:[%s4267_s11 + $0x1e8] sm:$0xf0]  ;;  %v2682_v63 = vor.u32 %v2945_v8, %v2681_v62  ;;  %v2809_v43 = vld [vmem:[%s4267_s11 + $0x200] sm:$0xf] }
 0x5fc   : > { %v2960_v8 = vld [vmem:[%s4267_s11 + $0x184] sm:$0xf] }
 0x5fd   : > { %1509 = vmatpush.bf16.msra.mxu2 %v2505_v55  ;;  %v2975_v55 = vld [vmem:[%s4267_s11 + $0x1f4] sm:$0xf0] }
 0x5fe   : > { %2000 = vmatpush.bf16.msra.mxu1 %v2666_v60  ;;  %1987 = vmatpush.bf16.msra.mxu0 %v2602_v4  ;;  %v2802_v60 = vor.u32 %v2975_v55, %v2801_v51  ;;  %v2785_v4 = vld [vmem:[%s4267_s11 + $0x1d0] sm:$0xf]  ;;  %v2803_v51 = vld [vmem:[%s4267_s11 + $0x1f8] sm:$0xf0]  ;;  %v2947_v55 = vld [vmem:[%s4267_s11 + $0x114] sm:$0xf0] }
 0x601   : > { %1510 = vmatpush.bf16.msra.mxu2 %v2485_v0  ;;  %v2926_v0 = vld [vmem:[%s4267_s11 + $0x74] sm:$0xf] }
 0x602   : > { %2001 = vmatpush.bf16.msra.mxu1 %v2658_v5  ;;  %1988 = vmatpush.bf16.msra.mxu0 %v2594_v16  ;;  %v2614_v3 = vor.u32 %v2926_v0, %v2611_v1  ;;  %v2971_v5 = vld [vmem:[%s4267_s11 + $0x1d4] sm:$0xf0]  ;;  %v2569_v16 = vld [vmem:[%s4267_s11 + $0x20] sm:$0xf]  ;;  %v2942_v0 = vld [vmem:[%s4267_s11 + $0xf4] sm:$0xf] }
 0x603   : > { %v2786_v6 = vor.u32 %v2971_v5, %v2785_v4  ;;  %v2570_v18 = vor.u32 %v2917_v17, %v2569_v16  ;;  %v2675_v1 = vld [vmem:[%s4267_s11 + $0xf8] sm:$0xf0]  ;;  %v2970_v4 = vld [vmem:[%s4267_s11 + $0x1d4] sm:$0xf]  ;;  %v2968_v16 = vld [vmem:[%s4267_s11 + $0x1c4] sm:$0xf] }
 0x605   : > { %1511 = vmatpush.bf16.msra.mxu2 %v2465_v10 }
 0x606   : > { %2002 = vmatpush.bf16.msra.mxu1 %v2650_v23  ;;  %1989 = vmatpush.bf16.msra.mxu0 %v2586_v28  ;;  %v2951_v23 = vld [vmem:[%s4267_s11 + $0x134] sm:$0xf0]  ;;  %v2561_v28 = vld [vmem:[%s4267_s11 + $0x10] sm:$0xf] }
 0x607   : > { %1464 = vmatmul.bf16.vlgmr.msrb.gmra.mxu3 %v3707_v46  ;;  %1490 = vmatmul.bf16.vlgmr.msrb.gmra.mxu1 %v3707_v46  ;;  %v2562_v31 = vor.u32 %v2915_v29, %v2561_v28  ;;  %v2966_v28 = vld [vmem:[%s4267_s11 + $0x1b4] sm:$0xf] }
 0x608   : > { %2548 = vmatmul.msk.bf16.vlgmr.msrb.gmra.mxu2 %vm1048_vm5, %v3709_v47  ;;  %2549 = vmatmul.msk.bf16.vlgmr.msrb.gmra.mxu0 %vm1048_vm5, %v3709_v47 }
 0x609   : > { %1512 = vmatpush.bf16.msra.mxu2 %v2445_v20  ;;  %2012 = vmatpush.bf16.msrb.mxu3 %v2738_v26  ;;  %v2603_v20 = vld [vmem:[%s4267_s11 + $0x68] sm:$0xf0]  ;;  %v2706_v26 = vor.u32 %v2951_v23, %v2705_v21  ;;  %v2938_v23 = vld [vmem:[%s4267_s11 + $0xd4] sm:$0xf] }
 0x60a   : > { %2003 = vmatpush.bf16.msra.mxu1 %v2642_v34  ;;  %1990 = vmatpush.bf16.msra.mxu0 %v2578_v44  ;;  %v2606_v22 = vor.u32 %v2924_v19, %v2603_v20  ;;  %v2949_v34 = vld [vmem:[%s4267_s11 + $0x124] sm:$0xf0]  ;;  %v2825_v19 = vld [vmem:[%s4267_s11 + $0x220] sm:$0xf]  ;;  %v2662_v25 = vor.u32 %v2938_v23, %v2659_v24 }
 0x60b   : > { %v2698_v37 = vor.u32 %v2949_v34, %v2697_v33  ;;  %v2981_v20 = vld [vmem:[%s4267_s11 + $0x224] sm:$0xf0] }
 0x60d   : > { %1513 = vmatpush.bf16.msra.mxu2 %v2425_v32  ;;  %2013 = vmatpush.bf16.msrb.mxu3 %v2730_v41  ;;  %v2595_v32 = vld [vmem:[%s4267_s11 + $0x58] sm:$0xf0]  ;;  %v2961_v41 = vld [vmem:[%s4267_s11 + $0x184] sm:$0xf0] }
 0x60e   : > { %2004 = vmatpush.bf16.msra.mxu1 %v2634_v50  ;;  %1991 = vmatpush.bf16.msra.mxu0 %v2570_v18  ;;  %v2598_v35 = vor.u32 %v2922_v30, %v2595_v32  ;;  %v2746_v44 = vor.u32 %v2961_v41, %v2745_v40  ;;  %v2974_v50 = vld [vmem:[%s4267_s11 + $0x1f4] sm:$0xf]  ;;  %v2779_v18 = vld [vmem:[%s4267_s11 + $0x1c8] sm:$0xf0]  ;;  %v2771_v30 = vld [vmem:[%s4267_s11 + $0x1b8] sm:$0xf0] }
 0x60f   : > { %v2806_v53 = vor.u32 %v2974_v50, %v2803_v51  ;;  %v2782_v21 = vor.u32 %v2968_v16, %v2779_v18  ;;  %v2979_v32 = vld [vmem:[%s4267_s11 + $0x214] sm:$0xf0]  ;;  %v2774_v33 = vor.u32 %v2966_v28, %v2771_v30  ;;  %v2964_v41 = vld [vmem:[%s4267_s11 + $0x1a4] sm:$0xf]  ;;  %v2934_v50 = vld [vmem:[%s4267_s11 + $0xb4] sm:$0xf] }
 0x610   : > { %v2643_v51 = vld [vmem:[%s4267_s11 + $0xb8] sm:$0xf0]  ;;  %v2619_v18 = vld [vmem:[%s4267_s11 + $0x88] sm:$0xf0] }
 0x611   : > { %1514 = vmatpush.bf16.msra.mxu2 %v2405_v45  ;;  %2014 = vmatpush.bf16.msrb.mxu3 %v2722_v54  ;;  %v2920_v45 = vld [vmem:[%s4267_s11 + $0x44] sm:$0xf]  ;;  %v2689_v54 = vld [vmem:[%s4267_s11 + $0x110] sm:$0xf] }
 0x612   : > { %2005 = vmatpush.bf16.msra.mxu1 %v2626_v59  ;;  %1992 = vmatpush.bf16.msra.mxu0 %v2562_v31  ;;  %v2590_v52 = vor.u32 %v2920_v45, %v2587_v49  ;;  %v2690_v56 = vor.u32 %v2947_v55, %v2689_v54  ;;  %v2972_v59 = vld [vmem:[%s4267_s11 + $0x1e4] sm:$0xf]  ;;  %v2817_v31 = vld [vmem:[%s4267_s11 + $0x210] sm:$0xf]  ;;  %v2977_v45 = vld [vmem:[%s4267_s11 + $0x204] sm:$0xf0] }
 0x613   : > { %v2818_v34 = vor.u32 %v2979_v32, %v2817_v31  ;;  %v2810_v49 = vor.u32 %v2977_v45, %v2809_v43  ;;  %v2962_v54 = vld [vmem:[%s4267_s11 + $0x194] sm:$0xf]  ;;  %v2755_v55 = vld [vmem:[%s4267_s11 + $0x198] sm:$0xf0] }
 0x614   : > { %v2954_v32 = vld [vmem:[%s4267_s11 + $0x154] sm:$0xf] }
 0x615   : > { %1515 = vmatpush.bf16.msra.mxu2 %v2385_v58  ;;  %2015 = vmatpush.bf16.msrb.mxu3 %v2714_v9  ;;  %v2579_v58 = vld [vmem:[%s4267_s11 + $0x38] sm:$0xf0]  ;;  %v2798_v9 = vor.u32 %v2972_v59, %v2795_v61  ;;  %v2758_v59 = vor.u32 %v2962_v54, %v2755_v55 }
 0x616   : > { %2006 = vmatpush.bf16.msra.mxu1 %v2618_v38  ;;  %1993 = vmatpush.bf16.msra.mxu0 %v2554_v48  ;;  %v2678_v38 = vor.u32 %v2942_v0, %v2675_v1  ;;  %v4095_v48 = vld [vmem:[%s4266_s10] sm:$0x1f] }
 0x617   : > { %2550 = vmatmul.msk.bf16.vlgmr.msra.gmra.mxu3 %vm1048_vm5, %v3709_v47  ;;  %v2969_v47 = vld [vmem:[%s4267_s11 + $0x1c4] sm:$0xf0]  ;;  %v1158_v61 = vperm.slane %v4095_v48, 1  ;;  %v1159_v43 = vperm.slane %v4095_v48, 2 }
 0x618   : > { %1516 = vmatmul.bf16.vlgmr.msra.gmra.mxu2 %v3707_v46  ;;  %v2778_v10 = vor.u32 %v2969_v47, %v2777_v7  ;;  %v2967_v46 = vld [vmem:[%s4267_s11 + $0x1b4] sm:$0xf0]  ;;  %v2833_v7 = vld [vmem:[%s4267_s11 + $0x230] sm:$0xf] }
 0x619   : > { %2025 = vmatpush.bf16.msrb.mxu2 %v2802_v60  ;;  %v2770_v36 = vor.u32 %v2967_v46, %v2769_v11  ;;  %2016 = vmatpush.bf16.msrb.mxu3 %v2706_v26  ;;  %v2582_v60 = vor.u32 %v2918_v57, %v2579_v58  ;;  %v2983_v47 = vld [vmem:[%s4267_s11 + $0x234] sm:$0xf0]  ;;  %v2940_v46 = vld [vmem:[%s4267_s11 + $0xe4] sm:$0xf]  ;;  %v1157_v57 = vperm.slane %v4095_v48, 0 }
 0x61a   : > { %2051 = vmatpush.bf16.msrb.mxu1 %v2614_v3  ;;  %v2571_v3 = vld [vmem:[%s4267_s11 + $0x28] sm:$0xf0]  ;;  %v2834_v11 = vor.u32 %v2983_v47, %v2833_v7  ;;  %v2912_v26 = vld [vmem:[%s4267_s11 + $0x4] sm:$0xf]  ;;  %v2739_v7 = vld [vmem:[%s4267_s11 + $0x178] sm:$0xf0] }
 0x61c   : > { %2042 = vmatpush.bf16.msrb.mxu0 %v2834_v11 }
 0x61d   : > { %2026 = vmatpush.bf16.msrb.mxu2 %v2794_v2  ;;  %2017 = vmatpush.bf16.msrb.mxu3 %v2698_v37  ;;  %v2916_v2 = vld [vmem:[%s4267_s11 + $0x24] sm:$0xf]  ;;  %v2651_v37 = vld [vmem:[%s4267_s11 + $0xc8] sm:$0xf0] }
 0x61e   : > { %2052 = vmatpush.bf16.msrb.mxu1 %v2606_v22  ;;  %v2574_v5 = vor.u32 %v2916_v2, %v2571_v3  ;;  %v2826_v22 = vor.u32 %v2981_v20, %v2825_v19  ;;  %v2930_v2 = vld [vmem:[%s4267_s11 + $0x94] sm:$0xf]  ;;  %v2627_v3 = vld [vmem:[%s4267_s11 + $0x98] sm:$0xf0] }
 0x61f   : > { %v2630_v47 = vor.u32 %v2930_v2, %v2627_v3 }
 0x620   : > { %2043 = vmatpush.bf16.msrb.mxu0 %v2826_v22  ;;  %v2731_v22 = vld [vmem:[%s4267_s11 + $0x168] sm:$0xf0] }
 0x621   : > { %2027 = vmatpush.bf16.msrb.mxu2 %v2786_v6  ;;  %2018 = vmatpush.bf16.msrb.mxu3 %v2690_v56  ;;  %v2787_v6 = vld [vmem:[%s4267_s11 + $0x1d8] sm:$0xf0]  ;;  %v2932_v56 = vld [vmem:[%s4267_s11 + $0xa4] sm:$0xf] }
 0x622   : > { %2053 = vmatpush.bf16.msrb.mxu1 %v2598_v35  ;;  %v2936_v35 = vld [vmem:[%s4267_s11 + $0xc4] sm:$0xf] }
 0x623   : > { %v2654_v40 = vor.u32 %v2936_v35, %v2651_v37  ;;  %v2978_v35 = vld [vmem:[%s4267_s11 + $0x214] sm:$0xf]  ;;  %v2819_v37 = vld [vmem:[%s4267_s11 + $0x218] sm:$0xf0] }
 0x624   : > { %2044 = vmatpush.bf16.msrb.mxu0 %v2818_v34  ;;  %v2822_v45 = vor.u32 %v2978_v35, %v2819_v37 }
 0x625   : > { %2028 = vmatpush.bf16.msrb.mxu2 %v2778_v10  ;;  %2019 = vmatpush.bf16.msrb.mxu3 %v2682_v63  ;;  %v2790_v10 = vor.u32 %v2970_v4, %v2787_v6  ;;  %v2958_v6 = vld [vmem:[%s4267_s11 + $0x174] sm:$0xf] }
 0x626   : > { %2054 = vmatpush.bf16.msrb.mxu1 %v2590_v52  ;;  %v2646_v52 = vor.u32 %v2934_v50, %v2643_v51  ;;  %v2742_v16 = vor.u32 %v2958_v6, %v2739_v7  ;;  %v2715_v50 = vld [vmem:[%s4267_s11 + $0x148] sm:$0xf0]  ;;  %v2976_v51 = vld [vmem:[%s4267_s11 + $0x204] sm:$0xf]  ;;  %v2946_v6 = vld [vmem:[%s4267_s11 + $0x114] sm:$0xf] }
 0x627   : > { %v2691_v7 = vld [vmem:[%s4267_s11 + $0x118] sm:$0xf0] }
 0x628   : > { %2045 = vmatpush.bf16.msrb.mxu0 %v2810_v49  ;;  %v2952_v49 = vld [vmem:[%s4267_s11 + $0x144] sm:$0xf] }
 0x629   : > { %2029 = vmatpush.bf16.msrb.mxu2 %v2770_v36  ;;  %2064 = vmatpush.bf16.msra.mxu3 %v2678_v38  ;;  %v2667_v36 = vld [vmem:[%s4267_s11 + $0xe8] sm:$0xf0]  ;;  %v2718_v55 = vor.u32 %v2952_v49, %v2715_v50 }
 0x62a   : > { %2055 = vmatpush.bf16.msrb.mxu1 %v2582_v60  ;;  %v2670_v39 = vor.u32 %v2940_v46, %v2667_v36  ;;  %v2635_v60 = vld [vmem:[%s4267_s11 + $0xa8] sm:$0xf0]  ;;  %v2982_v46 = vld [vmem:[%s4267_s11 + $0x234] sm:$0xf]  ;;  %v2835_v36 = vld [vmem:[%s4267_s11 + $0x238] sm:$0xf0] }
 0x62b   : > { %v2638_v62 = vor.u32 %v2932_v56, %v2635_v60  ;;  %v2838_v20 = vor.u32 %v2982_v46, %v2835_v36  ;;  %v2950_v60 = vld [vmem:[%s4267_s11 + $0x134] sm:$0xf]  ;;  %v1161_v46 = vperm.slane %v4095_v48, 4 }
 0x62d   : > { %2030 = vmatpush.bf16.msrb.mxu2 %v2762_v15  ;;  %v2563_v15 = vld [vmem:[%s4267_s11 + $0x18] sm:$0xf0]  ;;  %2065 = vmatpush.bf16.msra.mxu3 %v2670_v39 }
 0x62e   : > { %2056 = vmatpush.bf16.msrb.mxu1 %v2574_v5  ;;  %v2566_v17 = vor.u32 %v2914_v14, %v2563_v15 }
 0x631   : > { %2031 = vmatpush.bf16.msrb.mxu2 %v2754_v27  ;;  %v2555_v27 = vld [vmem:[%s4267_s11 + $0x8] sm:$0xf0]  ;;  %2066 = vmatpush.bf16.msra.mxu3 %v2662_v25  ;;  %v2980_v25 = vld [vmem:[%s4267_s11 + $0x224] sm:$0xf] }
 0x632   : > { %2057 = vmatpush.bf16.msrb.mxu1 %v2566_v17  ;;  %v2558_v29 = vor.u32 %v2912_v26, %v2555_v27  ;;  %v2928_v17 = vld [vmem:[%s4267_s11 + $0x84] sm:$0xf]  ;;  %v2827_v26 = vld [vmem:[%s4267_s11 + $0x228] sm:$0xf0]  ;;  %v1160_v27 = vperm.slane %v4095_v48, 3 }
 0x633   : > { %v2622_v23 = vor.u32 %v2928_v17, %v2619_v18  ;;  %v2830_v31 = vor.u32 %v2980_v25, %v2827_v26  ;;  %v1616_v25 = vld [vmem:[%s4268_s12] sm:$0x3] }
 0x635   : > { %2032 = vmatpush.bf16.msrb.mxu2 %v2746_v44  ;;  %v2763_v44 = vld [vmem:[%s4267_s11 + $0x1a8] sm:$0xf0]  ;;  %2067 = vmatpush.bf16.msra.mxu3 %v2654_v40 }
 0x636   : > { %2058 = vmatpush.bf16.msrb.mxu1 %v2558_v29  ;;  %v2766_v42 = vor.u32 %v2964_v41, %v2763_v44 }
 0x639   : > { %2090 = vmatpush.bf16.msra.mxu2 %v2806_v53  ;;  %2068 = vmatpush.bf16.msra.mxu3 %v2646_v52  ;;  %v2811_v52 = vld [vmem:[%s4267_s11 + $0x208] sm:$0xf0] }
 0x63d   : > { %2091 = vmatpush.bf16.msra.mxu2 %v2798_v9  ;;  %v2747_v9 = vld [vmem:[%s4267_s11 + $0x188] sm:$0xf0]  ;;  %2069 = vmatpush.bf16.msra.mxu3 %v2638_v62 }
 0x63e   : > { %v2750_v0 = vor.u32 %v2960_v8, %v2747_v9 }
 0x641   : > { %2092 = vmatpush.bf16.msra.mxu2 %v2790_v10  ;;  %2070 = vmatpush.bf16.msra.mxu3 %v2630_v47  ;;  %v2694_v47 = vor.u32 %v2946_v6, %v2691_v7 }
 0x645   : > { %2093 = vmatpush.bf16.msra.mxu2 %v2782_v21  ;;  %v2956_v21 = vld [vmem:[%s4267_s11 + $0x164] sm:$0xf]  ;;  %2071 = vmatpush.bf16.msra.mxu3 %v2622_v23 }
 0x646   : > { %v2734_v29 = vor.u32 %v2956_v21, %v2731_v22 }
 0x649   : > { %2094 = vmatpush.bf16.msra.mxu2 %v2774_v33  ;;  %v2723_v33 = vld [vmem:[%s4267_s11 + $0x158] sm:$0xf0] }
 0x64a   : > { %v2726_v44 = vor.u32 %v2954_v32, %v2723_v33 }
 0x64d   : > { %2095 = vmatpush.bf16.msra.mxu2 %v2766_v42 }
 0x651   : > { %2096 = vmatpush.bf16.msra.mxu2 %v2758_v59  ;;  %v2814_v59 = vor.u32 %v2976_v51, %v2811_v52  ;;  %v1619_v51 = vperm.slane %v1616_v25, 1 }
 0x655   : > { %2097 = vmatpush.bf16.msra.mxu2 %v2750_v0 }
 0x674   : > { %v1413_v53 = vpop.f32.mrf.mxu1 }
 0x675   : > { %v1439_v58 = vpop.f32.mrf.mxu0  ;;  %v1414_v63 = vadd.f32 %v1413_v53, %v1157_v57 }
 0x676   : > { %v1440_v1 = vadd.f32 %v1439_v58, %v1158_v61  ;;  %v2707_v61 = vld [vmem:[%s4267_s11 + $0x138] sm:$0xf0] }
 0x67a   : > { %v1426_v38 = vpop.f32.mrf.mxu3 }
 0x67b   : > { %v1427_v4 = vadd.f32 %v1426_v38, %v1414_v63  ;;  %v1452_v5 = vpop.f32.mrf.mxu2  ;;  %v2710_v63 = vor.u32 %v2950_v60, %v2707_v61  ;;  %v2699_v38 = vld [vmem:[%s4267_s11 + $0x128] sm:$0xf0] }
 0x67c   : > { %v1453_v10 = vadd.f32 %v1452_v5, %v1440_v1  ;;  %v1415_v11 = vpop.f32.mrf.mxu1  ;;  %v2948_v1 = vld [vmem:[%s4267_s11 + $0x124] sm:$0xf] }
 0x67d   : > { %v1534_v39 = vmax.f32 %v1427_v4, 0.0  ;;  %v1441_v14 = vpop.f32.mrf.mxu0  ;;  %v2702_v4 = vor.u32 %v2948_v1, %v2699_v38  ;;  %v2683_v11 = vld [vmem:[%s4267_s11 + $0x108] sm:$0xf0] }
 0x67e   : > { %v1535_v15 = vmax.f32 %v1453_v10, 0.0  ;;  %v2944_v10 = vld [vmem:[%s4267_s11 + $0x104] sm:$0xf] }
 0x67f   : > { %v1539_v19 = vpack.c.bf16 %v1534_v39, %v1534_v39  ;;  %v2686_v39 = vor.u32 %v2944_v10, %v2683_v11 }
 0x680   : > { %v4153_v24 = vpack.c.bf16 %v1535_v15, %v1535_v15 }
 0x681   : > { %1994 = vmatmul.bf16.vlgmr.msra.gmra.mxu0 %v1539_v19 }
 0x682   : > { %2007 = vmatmul.bf16.vlgmr.msra.gmra.mxu1 %v4153_v24  ;;  %v1428_v28 = vpop.f32.mrf.mxu3  ;;  %2077 = vmatpush.bf16.msra.mxu0 %v2742_v16 }
 0x683   : > { %v1454_v30 = vpop.f32.mrf.mxu2  ;;  %2107 = vmatpush.bf16.msra.mxu1 %v2838_v20  ;;  %v1618_v28 = vperm.slane %v1616_v25, 0 }
 0x684   : > { %v1491_v34 = vpop.f32.mrf.mxu1 }
 0x685   : > { %v1492_v40 = vadd.f32 %v1491_v34, %v1160_v27  ;;  %v1504_v41 = vpop.f32.mrf.mxu0 }
 0x686   : > { %2078 = vmatpush.bf16.msra.mxu0 %v2734_v29 }
 0x687   : > { %v1505_v42 = vadd.f32 %v1504_v41, %v1492_v40  ;;  %2108 = vmatpush.bf16.msra.mxu1 %v2830_v31 }
 0x689   : > { %v1537_v53 = vmax.f32 %v1505_v42, 0.0 }
 0x68a   : > { %v1465_v54 = vpop.f32.mrf.mxu3  ;;  %2079 = vmatpush.bf16.msra.mxu0 %v2726_v44 }
 0x68b   : > { %v1542_v56 = vpack.c.bf16 %v1537_v53, %v1537_v53  ;;  %v1466_v57 = vadd.f32 %v1465_v54, %v1159_v43  ;;  %v1478_v58 = vpop.f32.mrf.mxu2  ;;  %2109 = vmatpush.bf16.msra.mxu1 %v2822_v45 }
 0x68c   : > { %v1493_v62 = vpop.f32.mrf.mxu1 }
 0x68d   : > { %v1479_v8 = vadd.f32 %v1478_v58, %v1466_v57  ;;  %v1506_v9 = vpop.f32.mrf.mxu0  ;;  %2033 = vmatmul.bf16.vlgmr.msrb.gmra.mxu2 %v1542_v56 }
 0x68e   : > { %2080 = vmatpush.bf16.msra.mxu0 %v2718_v55 }
 0x68f   : > { %v1536_v0 = vmax.f32 %v1479_v8, 0.0  ;;  %2110 = vmatpush.bf16.msra.mxu1 %v2814_v59 }
 0x691   : > { %v1541_v2 = vpack.c.bf16 %v1536_v0, %v1536_v0 }
 0x692   : > { %2059 = vmatmul.bf16.vlgmr.msrb.gmra.mxu1 %v1539_v19  ;;  %v1467_v3 = vpop.f32.mrf.mxu3  ;;  %2081 = vmatpush.bf16.msra.mxu0 %v2710_v63 }
 0x693   : > { %v1480_v5 = vpop.f32.mrf.mxu2  ;;  %2020 = vmatmul.bf16.vlgmr.msrb.gmra.mxu3 %v1541_v2 }
 0x696   : > { %2082 = vmatpush.bf16.msra.mxu0 %v2702_v4 }
 0x69a   : > { %v1530_v36 = vpop.f32.mrf.mxu3  ;;  %2083 = vmatpush.bf16.msra.mxu0 %v2694_v47 }
 0x69b   : > { %v1517_v14 = vpop.f32.mrf.mxu2 }
 0x69c   : > { %v1518_v15 = vadd.f32 %v1517_v14, %v1161_v46 }
 0x69d   : > { %2098 = vmatmul.bf16.vlgmr.msra.gmra.mxu2 %v1542_v56 }
 0x69e   : > { %v1531_v16 = vadd.f32 %v1530_v36, %v1518_v15  ;;  %2084 = vmatpush.bf16.msra.mxu0 %v2686_v39 }
 0x6a0   : > { %v1538_v17 = vmax.f32 %v1531_v16, 0.0 }
 0x6a2   : > { %v1543_v18 = vpack.c.bf16 %v1538_v17, %v1538_v17  ;;  %v1532_v19 = vpop.f32.mrf.mxu3 }
 0x6a3   : > { %v1519_v20 = vpop.f32.mrf.mxu2  ;;  %2072 = vmatmul.bf16.vlgmr.msra.gmra.mxu3 %v4153_v24 }
 0x6a4   : > { %2839 = vmatmul.msk.bf16.vlgmr.msrb.gmra.mxu0 %vm1982_vm10, %v1543_v18  ;;  %2840 = vmatmul.msk.bf16.vlgmr.msra.gmra.mxu1 %vm1982_vm10, %v1543_v18 }
 0x6b4   : > { %2085 = vmatmul.bf16.vlgmr.msra.gmra.mxu0 %v1541_v2 }
 0x6fe   : > { %v1995_v48 = vpop.f32.mrf.mxu0 }
 0x6ff   : > { %v2008_v21 = vpop.f32.mrf.mxu1  ;;  %v1996_v29 = vadd.f32 %v1995_v48, %v1618_v28 }
 0x701   : > { %v2009_v32 = vadd.f32 %v2008_v21, %v1996_v29 }
 0x706   : > { %v1997_v22 = vpop.f32.mrf.mxu0 }
 0x707   : > { %v2010_v23 = vpop.f32.mrf.mxu1 }
 0x70f   : > { %v2060_v26 = vpop.f32.mrf.mxu1 }
 0x710   : > { %v2034_v27 = vpop.f32.mrf.mxu2  ;;  %v2061_v52 = vadd.f32 %v2060_v26, %v1619_v51 }
 0x716   : > { %v2021_v30 = vpop.f32.mrf.mxu3 }
 0x717   : > { %v2062_v31 = vpop.f32.mrf.mxu1  ;;  %v2022_v33 = vadd.f32 %v2021_v30, %v2009_v32 }
 0x718   : > { %v2036_v24 = vpop.f32.mrf.mxu2 }
 0x719   : > { %v2035_v35 = vadd.f32 %v2034_v27, %v2022_v33 }
 0x71e   : > { %v2023_v34 = vpop.f32.mrf.mxu3 }
 0x720   : > { %v2099_v37 = vpop.f32.mrf.mxu2 }
 0x721   : > { %v2047_v40 = vpop.f32.mrf.mxu0  ;;  %v2112_v41 = vpop.f32.mrf.mxu1 }
 0x722   : > { %v2048_v44 = vadd.f32 %v2047_v40, %v2035_v35 }
 0x724   : > { %v2116_v42 = vadd.f32 %v2048_v44, %v3451_v13 }
 0x726   : > { %2118 = vst [vmem:[%s493_s2] sm:$0xff] %v2116_v42  ;;  %v2073_v43 = vpop.f32.mrf.mxu3 }
 0x727   : > { %v2074_v54 = vadd.f32 %v2073_v43, %v2061_v52 }
 0x728   : > { %v2101_v45 = vpop.f32.mrf.mxu2 }
 0x729   : > { %v2049_v49 = vpop.f32.mrf.mxu0  ;;  %v2114_v50 = vpop.f32.mrf.mxu1 }
 0x72e   : > { %v2075_v53 = vpop.f32.mrf.mxu3 }
 0x731   : > { %v2086_v55 = vpop.f32.mrf.mxu0 }
 0x732   : > { %v2087_v56 = vadd.f32 %v2086_v55, %v2074_v54 }
 0x734   : > { %v2100_v13 = vadd.f32 %v2099_v37, %v2087_v56 }
 0x736   : > { %v2113_v57 = vadd.f32 %v2112_v41, %v2100_v13 }
 0x738   : > { %v2117_v58 = vadd.f32 %v2113_v57, %v3449_v12 }
 0x739   : > { %v2088_v59 = vpop.f32.mrf.mxu0 }
 0x73a   : > { %2119 = vst.msk [vmem:[%s493_s2 + $0x8] sm:$0xff] %vm1048_vm5, %v2117_v58 }
 0x73b   : > { %3072 = shalt.err (!%p3069_p3)
}
 0x73c   : > { %2985 = dma.vmem_to_hbm [thread:$0]  (%p3218_p5), %s2135_s16, 256, %s2137_s23, %s2121_s29  }
 0x73d PF: > { %p2991_p4 = scmp.ge.s32.totalorder %s3107_s28, 2  ;;  %s2148_s22 = sand.u32 1, %s3095_s25  }
 0x73e   : > { %s2149_s2 = scalar_lea.sflag [#allocation3], %s2148_s22 }
 0x73f   : > { %p2988_p7 = pnand %p2991_p4, %p3222_p6 }
 0x741   : > { %p2989_p8 = pneg %p2988_p7 }
 0x743   : > { %3090 = dma.done.wait (%p2989_p8), %s2149_s2, 256  }
 0x744   : > { %3092 = vsyncadd (%p2989_p8), %s2149_s2, 4294967040  ;;  %s4286_s28 = sld [smem:[#allocation6_spill]]  ;;  %s4289_s25 = smov %s3099_s26 }
 0x745   : > { %s4287_s3 = sld [smem:[#allocation5_spill]] }
 0x746   : > { %s4288_s27 = sld [smem:[#allocation7_spill]] }
 0x74a   : > { %p23_p9 = scmp.ge.s32.totalorder %s4286_s28, 4  }
 0x74b   : > { %s4290_s26 = smov %s4287_s3 }
 0x74c   :  { %25 = sbr.rel (!%p23_p9) target bundleno = 8 (0x8), region = 134 }
 0x751   :  { %2155 = vsyncpa [#allocation3], 1 }
 0x752   :  { %2157 = vsyncpa [#allocation3 + $0x1], 1 }

</bundles_post_ra>
